<compile_context>
chip_gen: v5e
topology: v5e:2x2
jax: 0.10.0
libtpu: 0.0.40
codegen_flags: <defaults>
</compile_context>

<pallas_src>
import jax
import jax.numpy as jnp
from jax.experimental import pallas as pl
from jax.experimental.pallas import tpu as pltpu

BN_EPS = 1e-5


def _make_conv_block_kernel(N, H, W, C0, C1):
    """Fused two-layer ConvBNRelu kernel, specialized to static shapes."""

    def kernel(x_ref, w0_ref, w1_ref, g0_ref, be0_ref, g1_ref, be1_ref,
               fold_ref, spread_ref, o_ref,
               xpad0_ref, patch0_ref, xpad1_ref, patch1_ref):
        # x_ref:      (N, H, W*C0)        unpadded NHWC slab
        # w0_ref:     (9*W*C0, W*C1)      block-diagonal conv0 weight
        # w1_ref:     (9*W*C1, W*C1)      block-diagonal conv1 weight
        # g*/be*_ref: (1, C1)             BN gamma / beta
        # fold_ref:   (W*C1, C1)          sums the W channel groups of a slab row
        # spread_ref: (C1, W*C1)          broadcasts a per-channel vector to slab lanes
        # o_ref:      (N*H, W*C1)         lane-dense output slab
        inv_cnt = 1.0 / float(N * H * W)
        taps = [(dy, dx) for dy in range(3) for dx in range(3)]

        def conv_bn_relu(xpad_ref, patch_ref, w_ref, g_ref, be_ref, cin):
            # --- im2col into VMEM scratch: tap t occupies lanes [t*W*cin, (t+1)*W*cin)
            for t, (dy, dx) in enumerate(taps):
                patch_ref[:, :, t * W * cin:(t + 1) * W * cin] = (
                    xpad_ref[:, dy:dy + H, dx * cin:(dx + W) * cin])
            patch = patch_ref[...].reshape(N * H, 9 * W * cin)

            # --- single MXU contraction (K = 9*W*cin) against block-diag weight
            # TODO(synk): on v6e/v7x cast patch / w_ref to bfloat16 here (keep
            # f32 accumulation) for ~2x MXU throughput; kept f32 to preserve
            # 1e-4 parity with the f32 reference.
            y = jnp.dot(patch, w_ref[...], preferred_element_type=jnp.float32)

            # --- BatchNorm2d, training-mode batch stats, one pass (sum, sumsq),
            #     folded into a single per-channel scale/shift.  (The conv bias
            #     is intentionally absent: BN's mean subtraction cancels it.)
            rsum = jnp.sum(y, axis=0, keepdims=True)            # (1, W*C1)
            rsumsq = jnp.sum(y * y, axis=0, keepdims=True)      # (1, W*C1)
            csum = jnp.dot(rsum, fold_ref[...],
                           preferred_element_type=jnp.float32)  # (1, C1)
            csumsq = jnp.dot(rsumsq, fold_ref[...],
                             preferred_element_type=jnp.float32)
            mean = csum * inv_cnt
            var = csumsq * inv_cnt - mean * mean
            scale = g_ref[...] * jax.lax.rsqrt(var + BN_EPS)    # (1, C1)
            shift = be_ref[...] - mean * scale
            scale_l = jnp.dot(scale, spread_ref[...],
                              preferred_element_type=jnp.float32)  # (1, W*C1)
            shift_l = jnp.dot(shift, spread_ref[...],
                              preferred_element_type=jnp.float32)
            return jnp.maximum(y * scale_l + shift_l, 0.0)      # (N*H, W*C1)

        # ---------- layer 0: zero-pad the input inside the kernel ----------
        xpad0_ref[...] = jnp.zeros(xpad0_ref.shape, xpad0_ref.dtype)
        xpad0_ref[:, 1:H + 1, C0:(W + 1) * C0] = x_ref[...].astype(jnp.float32)
        y0 = conv_bn_relu(xpad0_ref, patch0_ref, w0_ref, g0_ref, be0_ref, C0)

        # ---------- layer 1: activation stays in VMEM ----------
        xpad1_ref[...] = jnp.zeros(xpad1_ref.shape, xpad1_ref.dtype)
        xpad1_ref[:, 1:H + 1, C1:(W + 1) * C1] = y0.reshape(N, H, W * C1)
        y1 = conv_bn_relu(xpad1_ref, patch1_ref, w1_ref, g1_ref, be1_ref, C1)

        # Lane-dense output store (W*C1 = 128 lanes at these shapes).
        o_ref[...] = y1.astype(o_ref.dtype)

    return kernel


def _block_diag_weight(w, W):
    """(3,3,Cin,Cout) HWIO conv weight -> (9*W*Cin, W*Cout) slab weight.

    Row layout t*W*Cin + w*Cin + ci matches the im2col patch; column layout
    w*Cout + co matches the lane-dense output slab.
    """
    Cin, Cout = w.shape[2], w.shape[3]
    w9 = w.reshape(9, Cin, Cout)
    eye_w = jnp.eye(W, dtype=w.dtype)
    blk = jnp.einsum('tio,wv->twivo', w9, eye_w)      # (9, W, Cin, W, Cout)
    return blk.reshape(9 * W * Cin, W * Cout)


def _conv_block_forward_impl(x_nchw, params):
    N, C0, H, W = x_nchw.shape
    C1 = params["w0"].shape[-1]

    # Model-boundary layout change only: NCHW -> lane-dense NHWC slab.
    x_slab = jnp.transpose(x_nchw, (0, 2, 3, 1)).reshape(N, H, W * C0)

    wblk0 = _block_diag_weight(params["w0"], W)       # (9*W*C0, W*C1)
    wblk1 = _block_diag_weight(params["w1"], W)       # (9*W*C1, W*C1)

    eye_c = jnp.eye(C1, dtype=jnp.float32)
    fold = jnp.tile(eye_c, (W, 1))                    # (W*C1, C1)
    spread = jnp.tile(eye_c, (1, W))                  # (C1, W*C1)

    g0 = params["g0"].reshape(1, C1)
    be0 = params["be0"].reshape(1, C1)
    g1 = params["g1"].reshape(1, C1)
    be1 = params["be1"].reshape(1, C1)
    # NOTE: conv biases b0/b1 are NOT passed in -- training-mode BN cancels them.

    vmem = pl.BlockSpec(memory_space=pltpu.MemorySpace.VMEM)
    kernel = _make_conv_block_kernel(N, H, W, C0, C1)

    # TODO(synk): for activations too large for VMEM, add a grid over N/H rows
    # with a 1-row halo, carry per-channel sum/sumsq across an 'arbitrary' grid
    # axis (two-pass BN), and mark the row/batch axis 'parallel' so v7x's two
    # TensorCores split the work.  At these shapes the whole problem fits VMEM.
    out2d = pl.pallas_call(
        kernel,
        out_shape=jax.ShapeDtypeStruct((N * H, W * C1), x_nchw.dtype),
        in_specs=[vmem] * 9,
        out_specs=vmem,
        scratch_shapes=[
            pltpu.VMEM((N, H + 2, (W + 2) * C0), jnp.float32),   # padded input 0
            pltpu.VMEM((N, H, 9 * W * C0), jnp.float32),         # im2col patch 0
            pltpu.VMEM((N, H + 2, (W + 2) * C1), jnp.float32),   # padded act 1
            pltpu.VMEM((N, H, 9 * W * C1), jnp.float32),         # im2col patch 1
        ],
    )(x_slab, wblk0, wblk1, g0, be0, g1, be1, fold, spread)

    # Undo the slab layout at the model boundary (free reshape + one transpose).
    return jnp.transpose(out2d.reshape(N, H, W, C1), (0, 3, 1, 2))


conv_block_forward = jax.jit(_conv_block_forward_impl)


def init_conv_block_params(key, channel):
    """ConvBlock(final=False): conv0: C0->C1, conv1: C1->C1, 3x3 kaiming."""
    c0, c1 = channel
    k0, k1, k2, k3 = jax.random.split(key, 4)

    def kaiming(k, cin, cout):
        std = (2.0 / (cin * 3 * 3)) ** 0.5
        return std * jax.random.normal(k, (3, 3, cin, cout), jnp.float32)

    def conv_bias(k, cin, cout):
        bound = 1.0 / (cin * 3 * 3) ** 0.5
        return jax.random.uniform(k, (cout,), jnp.float32, -bound, bound)

    return {
        "w0": kaiming(k0, c0, c1), "b0": conv_bias(k1, c0, c1),
        "g0": jnp.ones((c1,), jnp.float32), "be0": jnp.zeros((c1,), jnp.float32),
        "w1": kaiming(k2, c1, c1), "b1": conv_bias(k3, c1, c1),
        "g1": jnp.ones((c1,), jnp.float32), "be1": jnp.zeros((c1,), jnp.float32),
    }


def _reference_forward(x_nchw, params):
    """Plain-JAX reference (lax conv + batch-stat BN + ReLU), includes the conv
    bias to demonstrate that dropping it in the kernel is exact."""
    def cbr(x, w, b, g, be):
        y = jax.lax.conv_general_dilated(
            x, w, window_strides=(1, 1), padding=((1, 1), (1, 1)),
            dimension_numbers=("NCHW", "HWIO", "NCHW"))
        y = y + b[None, :, None, None]
        mean = jnp.mean(y, axis=(0, 2, 3), keepdims=True)
        var = jnp.mean((y - mean) ** 2, axis=(0, 2, 3), keepdims=True)
        y = (y - mean) * jax.lax.rsqrt(var + BN_EPS)
        y = y * g[None, :, None, None] + be[None, :, None, None]
        return jnp.maximum(y, 0.0)

    y = cbr(x_nchw, params["w0"], params["b0"], params["g0"], params["be0"])
    y = cbr(y, params["w1"], params["b1"], params["g1"], params["be1"])
    return y


if __name__ == "__main__":
    key = jax.random.PRNGKey(0)
    k_x, k_p = jax.random.split(key)

    channel = [4, 8]                      # ConvBlock(channel=[4, 8], final=False)
    x = jax.random.normal(k_x, (2, channel[0], 16, 16), jnp.float32)   # NCHW
    params = init_conv_block_params(k_p, channel)

    out = jax.block_until_ready(conv_block_forward(x, params))

    ref = _reference_forward(x, params)
    assert out.shape == (2, channel[1], 16, 16)
    assert jnp.allclose(out, ref, atol=1e-4, rtol=1e-4), "mismatch vs reference"

    print("KERNEL_OK")
</pallas_src>

<mosaic_0001>
module attributes {stable_mosaic.version = 11 : i64} {
  func.func @kernel(%arg0: memref<2x16x64xf32, #tpu.memory_space<vmem>>, %arg1: memref<576x128xf32, #tpu.memory_space<vmem>>, %arg2: memref<1152x128xf32, #tpu.memory_space<vmem>>, %arg3: memref<1x8xf32, #tpu.memory_space<vmem>>, %arg4: memref<1x8xf32, #tpu.memory_space<vmem>>, %arg5: memref<1x8xf32, #tpu.memory_space<vmem>>, %arg6: memref<1x8xf32, #tpu.memory_space<vmem>>, %arg7: memref<128x8xf32, #tpu.memory_space<vmem>>, %arg8: memref<8x128xf32, #tpu.memory_space<vmem>>, %arg9: memref<32x128xf32, #tpu.memory_space<vmem>>, %arg10: memref<2x18x72xf32, #tpu.memory_space<vmem>>, %arg11: memref<2x16x576xf32, #tpu.memory_space<vmem>>, %arg12: memref<2x18x144xf32, #tpu.memory_space<vmem>>, %arg13: memref<2x16x1152xf32, #tpu.memory_space<vmem>>) attributes {dimension_semantics = [], scalar_prefetch = 0 : i64, scratch_operands = 4 : i64, tpu.core_type = #tpu.core_type<tc>} {
    %cst = arith.constant 0.000000e+00 : f32
    %0 = vector.broadcast %cst : f32 to vector<2x18x72xf32>
    %c0 = arith.constant 0 : index
    %c0_0 = arith.constant 0 : index
    %c0_1 = arith.constant 0 : index
    %1 = vector.load %arg10[%c0, %c0_0, %c0_1] : memref<2x18x72xf32, #tpu.memory_space<vmem>>, vector<2x18x72xf32>
    tpu.vector_store %arg10[%c0, %c0_0, %c0_1], %0 {strides = array<i32>} : memref<2x18x72xf32, #tpu.memory_space<vmem>>, vector<2x18x72xf32>,
    %c0_2 = arith.constant 0 : index
    %c0_3 = arith.constant 0 : index
    %c0_4 = arith.constant 0 : index
    %2 = vector.load %arg0[%c0_2, %c0_3, %c0_4] : memref<2x16x64xf32, #tpu.memory_space<vmem>>, vector<2x16x64xf32>
    %c0_5 = arith.constant 0 : index
    %c1 = arith.constant 1 : index
    %c4 = arith.constant 4 : index
    %3 = vector.load %arg10[%c0_5, %c1, %c4] : memref<2x18x72xf32, #tpu.memory_space<vmem>>, vector<2x16x64xf32>
    tpu.vector_store %arg10[%c0_5, %c1, %c4], %2 {strides = array<i32>} : memref<2x18x72xf32, #tpu.memory_space<vmem>>, vector<2x16x64xf32>,
    %c0_6 = arith.constant 0 : index
    %c0_7 = arith.constant 0 : index
    %c0_8 = arith.constant 0 : index
    %4 = vector.load %arg10[%c0_6, %c0_7, %c0_8] : memref<2x18x72xf32, #tpu.memory_space<vmem>>, vector<2x16x64xf32>
    %c0_9 = arith.constant 0 : index
    %c0_10 = arith.constant 0 : index
    %c0_11 = arith.constant 0 : index
    %5 = vector.load %arg11[%c0_9, %c0_10, %c0_11] : memref<2x16x576xf32, #tpu.memory_space<vmem>>, vector<2x16x64xf32>
    tpu.vector_store %arg11[%c0_9, %c0_10, %c0_11], %4 {strides = array<i32>} : memref<2x16x576xf32, #tpu.memory_space<vmem>>, vector<2x16x64xf32>,
    %c0_12 = arith.constant 0 : index
    %c0_13 = arith.constant 0 : index
    %c4_14 = arith.constant 4 : index
    %6 = vector.load %arg10[%c0_12, %c0_13, %c4_14] : memref<2x18x72xf32, #tpu.memory_space<vmem>>, vector<2x16x64xf32>
    %c0_15 = arith.constant 0 : index
    %c0_16 = arith.constant 0 : index
    %c64 = arith.constant 64 : index
    %7 = vector.load %arg11[%c0_15, %c0_16, %c64] : memref<2x16x576xf32, #tpu.memory_space<vmem>>, vector<2x16x64xf32>
    tpu.vector_store %arg11[%c0_15, %c0_16, %c64], %6 {strides = array<i32>} : memref<2x16x576xf32, #tpu.memory_space<vmem>>, vector<2x16x64xf32>,
    %c0_17 = arith.constant 0 : index
    %c0_18 = arith.constant 0 : index
    %c8 = arith.constant 8 : index
    %8 = vector.load %arg10[%c0_17, %c0_18, %c8] : memref<2x18x72xf32, #tpu.memory_space<vmem>>, vector<2x16x64xf32>
    %c0_19 = arith.constant 0 : index
    %c0_20 = arith.constant 0 : index
    %c128 = arith.constant 128 : index
    %9 = vector.load %arg11[%c0_19, %c0_20, %c128] : memref<2x16x576xf32, #tpu.memory_space<vmem>>, vector<2x16x64xf32>
    tpu.vector_store %arg11[%c0_19, %c0_20, %c128], %8 {strides = array<i32>} : memref<2x16x576xf32, #tpu.memory_space<vmem>>, vector<2x16x64xf32>,
    %c0_21 = arith.constant 0 : index
    %c1_22 = arith.constant 1 : index
    %c0_23 = arith.constant 0 : index
    %10 = vector.load %arg10[%c0_21, %c1_22, %c0_23] : memref<2x18x72xf32, #tpu.memory_space<vmem>>, vector<2x16x64xf32>
    %c0_24 = arith.constant 0 : index
    %c0_25 = arith.constant 0 : index
    %c192 = arith.constant 192 : index
    %11 = vector.load %arg11[%c0_24, %c0_25, %c192] : memref<2x16x576xf32, #tpu.memory_space<vmem>>, vector<2x16x64xf32>
    tpu.vector_store %arg11[%c0_24, %c0_25, %c192], %10 {strides = array<i32>} : memref<2x16x576xf32, #tpu.memory_space<vmem>>, vector<2x16x64xf32>,
    %c0_26 = arith.constant 0 : index
    %c1_27 = arith.constant 1 : index
    %c4_28 = arith.constant 4 : index
    %12 = vector.load %arg10[%c0_26, %c1_27, %c4_28] : memref<2x18x72xf32, #tpu.memory_space<vmem>>, vector<2x16x64xf32>
    %c0_29 = arith.constant 0 : index
    %c0_30 = arith.constant 0 : index
    %c256 = arith.constant 256 : index
    %13 = vector.load %arg11[%c0_29, %c0_30, %c256] : memref<2x16x576xf32, #tpu.memory_space<vmem>>, vector<2x16x64xf32>
    tpu.vector_store %arg11[%c0_29, %c0_30, %c256], %12 {strides = array<i32>} : memref<2x16x576xf32, #tpu.memory_space<vmem>>, vector<2x16x64xf32>,
    %c0_31 = arith.constant 0 : index
    %c1_32 = arith.constant 1 : index
    %c8_33 = arith.constant 8 : index
    %14 = vector.load %arg10[%c0_31, %c1_32, %c8_33] : memref<2x18x72xf32, #tpu.memory_space<vmem>>, vector<2x16x64xf32>
    %c0_34 = arith.constant 0 : index
    %c0_35 = arith.constant 0 : index
    %c320 = arith.constant 320 : index
    %15 = vector.load %arg11[%c0_34, %c0_35, %c320] : memref<2x16x576xf32, #tpu.memory_space<vmem>>, vector<2x16x64xf32>
    tpu.vector_store %arg11[%c0_34, %c0_35, %c320], %14 {strides = array<i32>} : memref<2x16x576xf32, #tpu.memory_space<vmem>>, vector<2x16x64xf32>,
    %c0_36 = arith.constant 0 : index
    %c2 = arith.constant 2 : index
    %c0_37 = arith.constant 0 : index
    %16 = vector.load %arg10[%c0_36, %c2, %c0_37] : memref<2x18x72xf32, #tpu.memory_space<vmem>>, vector<2x16x64xf32>
    %c0_38 = arith.constant 0 : index
    %c0_39 = arith.constant 0 : index
    %c384 = arith.constant 384 : index
    %17 = vector.load %arg11[%c0_38, %c0_39, %c384] : memref<2x16x576xf32, #tpu.memory_space<vmem>>, vector<2x16x64xf32>
    tpu.vector_store %arg11[%c0_38, %c0_39, %c384], %16 {strides = array<i32>} : memref<2x16x576xf32, #tpu.memory_space<vmem>>, vector<2x16x64xf32>,
    %c0_40 = arith.constant 0 : index
    %c2_41 = arith.constant 2 : index
    %c4_42 = arith.constant 4 : index
    %18 = vector.load %arg10[%c0_40, %c2_41, %c4_42] : memref<2x18x72xf32, #tpu.memory_space<vmem>>, vector<2x16x64xf32>
    %c0_43 = arith.constant 0 : index
    %c0_44 = arith.constant 0 : index
    %c448 = arith.constant 448 : index
    %19 = vector.load %arg11[%c0_43, %c0_44, %c448] : memref<2x16x576xf32, #tpu.memory_space<vmem>>, vector<2x16x64xf32>
    tpu.vector_store %arg11[%c0_43, %c0_44, %c448], %18 {strides = array<i32>} : memref<2x16x576xf32, #tpu.memory_space<vmem>>, vector<2x16x64xf32>,
    %c0_45 = arith.constant 0 : index
    %c2_46 = arith.constant 2 : index
    %c8_47 = arith.constant 8 : index
    %20 = vector.load %arg10[%c0_45, %c2_46, %c8_47] : memref<2x18x72xf32, #tpu.memory_space<vmem>>, vector<2x16x64xf32>
    %c0_48 = arith.constant 0 : index
    %c0_49 = arith.constant 0 : index
    %c512 = arith.constant 512 : index
    %21 = vector.load %arg11[%c0_48, %c0_49, %c512] : memref<2x16x576xf32, #tpu.memory_space<vmem>>, vector<2x16x64xf32>
    tpu.vector_store %arg11[%c0_48, %c0_49, %c512], %20 {strides = array<i32>} : memref<2x16x576xf32, #tpu.memory_space<vmem>>, vector<2x16x64xf32>,
    %c0_50 = arith.constant 0 : index
    %c0_51 = arith.constant 0 : index
    %c0_52 = arith.constant 0 : index
    %22 = vector.load %arg11[%c0_50, %c0_51, %c0_52] : memref<2x16x576xf32, #tpu.memory_space<vmem>>, vector<2x16x576xf32>
    %23 = vector.shape_cast %22 : vector<2x16x576xf32> to vector<32x576xf32>
    %c0_53 = arith.constant 0 : index
    %c0_54 = arith.constant 0 : index
    %24 = vector.load %arg1[%c0_53, %c0_54] : memref<576x128xf32, #tpu.memory_space<vmem>>, vector<576x128xf32>
    %cst_55 = arith.constant dense<0.000000e+00> : vector<32x128xf32>
    %25 = tpu.matmul %23, %24, %cst_55 {dimension_numbers = #tpu.dot_dimension_numbers<[1], [0], [0], [1], [0, 0, 1, 1], [], []>} : vector<32x576xf32>, vector<576x128xf32>, vector<32x128xf32> -> vector<32x128xf32>
    %cst_56 = arith.constant dense<0.000000e+00> : vector<128xf32>
    %26 = vector.multi_reduction <add>, %25, %cst_56 [0] : vector<32x128xf32> to vector<128xf32>
    %27 = vector.shape_cast %26 : vector<128xf32> to vector<1x128xf32>
    %28 = arith.mulf %25, %25 : vector<32x128xf32>
    %cst_57 = arith.constant dense<0.000000e+00> : vector<128xf32>
    %29 = vector.multi_reduction <add>, %28, %cst_57 [0] : vector<32x128xf32> to vector<128xf32>
    %30 = vector.shape_cast %29 : vector<128xf32> to vector<1x128xf32>
    %c0_58 = arith.constant 0 : index
    %c0_59 = arith.constant 0 : index
    %31 = vector.load %arg7[%c0_58, %c0_59] : memref<128x8xf32, #tpu.memory_space<vmem>>, vector<128x8xf32>
    %cst_60 = arith.constant dense<0.000000e+00> : vector<1x8xf32>
    %32 = tpu.matmul %27, %31, %cst_60 {dimension_numbers = #tpu.dot_dimension_numbers<[1], [0], [0], [1], [0, 0, 1, 1], [], []>} : vector<1x128xf32>, vector<128x8xf32>, vector<1x8xf32> -> vector<1x8xf32>
    %c0_61 = arith.constant 0 : index
    %c0_62 = arith.constant 0 : index
    %33 = vector.load %arg7[%c0_61, %c0_62] : memref<128x8xf32, #tpu.memory_space<vmem>>, vector<128x8xf32>
    %cst_63 = arith.constant dense<0.000000e+00> : vector<1x8xf32>
    %34 = tpu.matmul %30, %33, %cst_63 {dimension_numbers = #tpu.dot_dimension_numbers<[1], [0], [0], [1], [0, 0, 1, 1], [], []>} : vector<1x128xf32>, vector<128x8xf32>, vector<1x8xf32> -> vector<1x8xf32>
    %cst_64 = arith.constant 0.001953125 : f32
    %35 = vector.broadcast %cst_64 : f32 to vector<1x8xf32>
    %36 = arith.mulf %32, %35 : vector<1x8xf32>
    %cst_65 = arith.constant 0.001953125 : f32
    %37 = vector.broadcast %cst_65 : f32 to vector<1x8xf32>
    %38 = arith.mulf %34, %37 : vector<1x8xf32>
    %39 = arith.mulf %36, %36 : vector<1x8xf32>
    %40 = arith.subf %38, %39 : vector<1x8xf32>
    %c0_66 = arith.constant 0 : index
    %c0_67 = arith.constant 0 : index
    %41 = vector.load %arg3[%c0_66, %c0_67] : memref<1x8xf32, #tpu.memory_space<vmem>>, vector<1x8xf32>
    %cst_68 = arith.constant 9.99999974E-6 : f32
    %42 = vector.broadcast %cst_68 : f32 to vector<1x8xf32>
    %43 = arith.addf %40, %42 : vector<1x8xf32>
    %44 = math.rsqrt %43 : vector<1x8xf32>
    %45 = arith.mulf %41, %44 : vector<1x8xf32>
    %c0_69 = arith.constant 0 : index
    %c0_70 = arith.constant 0 : index
    %46 = vector.load %arg4[%c0_69, %c0_70] : memref<1x8xf32, #tpu.memory_space<vmem>>, vector<1x8xf32>
    %47 = arith.mulf %36, %45 : vector<1x8xf32>
    %48 = arith.subf %46, %47 : vector<1x8xf32>
    %c0_71 = arith.constant 0 : index
    %c0_72 = arith.constant 0 : index
    %49 = vector.load %arg8[%c0_71, %c0_72] : memref<8x128xf32, #tpu.memory_space<vmem>>, vector<8x128xf32>
    %cst_73 = arith.constant dense<0.000000e+00> : vector<1x128xf32>
    %50 = tpu.matmul %45, %49, %cst_73 {dimension_numbers = #tpu.dot_dimension_numbers<[1], [0], [0], [1], [0, 0, 1, 1], [], []>} : vector<1x8xf32>, vector<8x128xf32>, vector<1x128xf32> -> vector<1x128xf32>
    %c0_74 = arith.constant 0 : index
    %c0_75 = arith.constant 0 : index
    %51 = vector.load %arg8[%c0_74, %c0_75] : memref<8x128xf32, #tpu.memory_space<vmem>>, vector<8x128xf32>
    %cst_76 = arith.constant dense<0.000000e+00> : vector<1x128xf32>
    %52 = tpu.matmul %48, %51, %cst_76 {dimension_numbers = #tpu.dot_dimension_numbers<[1], [0], [0], [1], [0, 0, 1, 1], [], []>} : vector<1x8xf32>, vector<8x128xf32>, vector<1x128xf32> -> vector<1x128xf32>
    %53 = vector.broadcast %50 : vector<1x128xf32> to vector<32x128xf32>
    %54 = arith.mulf %25, %53 : vector<32x128xf32>
    %55 = vector.broadcast %52 : vector<1x128xf32> to vector<32x128xf32>
    %56 = arith.addf %54, %55 : vector<32x128xf32>
    %cst_77 = arith.constant 0.000000e+00 : f32
    %57 = vector.broadcast %cst_77 : f32 to vector<32x128xf32>
    %58 = arith.maximumf %56, %57 : vector<32x128xf32>
    %cst_78 = arith.constant 0.000000e+00 : f32
    %59 = vector.broadcast %cst_78 : f32 to vector<2x18x144xf32>
    %c0_79 = arith.constant 0 : index
    %c0_80 = arith.constant 0 : index
    %c0_81 = arith.constant 0 : index
    %60 = vector.load %arg12[%c0_79, %c0_80, %c0_81] : memref<2x18x144xf32, #tpu.memory_space<vmem>>, vector<2x18x144xf32>
    tpu.vector_store %arg12[%c0_79, %c0_80, %c0_81], %59 {strides = array<i32>} : memref<2x18x144xf32, #tpu.memory_space<vmem>>, vector<2x18x144xf32>,
    %61 = vector.shape_cast %58 : vector<32x128xf32> to vector<2x16x128xf32>
    %c0_82 = arith.constant 0 : index
    %c1_83 = arith.constant 1 : index
    %c8_84 = arith.constant 8 : index
    %62 = vector.load %arg12[%c0_82, %c1_83, %c8_84] : memref<2x18x144xf32, #tpu.memory_space<vmem>>, vector<2x16x128xf32>
    tpu.vector_store %arg12[%c0_82, %c1_83, %c8_84], %61 {strides = array<i32>} : memref<2x18x144xf32, #tpu.memory_space<vmem>>, vector<2x16x128xf32>,
    %c0_85 = arith.constant 0 : index
    %c0_86 = arith.constant 0 : index
    %c0_87 = arith.constant 0 : index
    %63 = vector.load %arg12[%c0_85, %c0_86, %c0_87] : memref<2x18x144xf32, #tpu.memory_space<vmem>>, vector<2x16x128xf32>
    %c0_88 = arith.constant 0 : index
    %c0_89 = arith.constant 0 : index
    %c0_90 = arith.constant 0 : index
    %64 = vector.load %arg13[%c0_88, %c0_89, %c0_90] : memref<2x16x1152xf32, #tpu.memory_space<vmem>>, vector<2x16x128xf32>
    tpu.vector_store %arg13[%c0_88, %c0_89, %c0_90], %63 {strides = array<i32>} : memref<2x16x1152xf32, #tpu.memory_space<vmem>>, vector<2x16x128xf32>,
    %c0_91 = arith.constant 0 : index
    %c0_92 = arith.constant 0 : index
    %c8_93 = arith.constant 8 : index
    %65 = vector.load %arg12[%c0_91, %c0_92, %c8_93] : memref<2x18x144xf32, #tpu.memory_space<vmem>>, vector<2x16x128xf32>
    %c0_94 = arith.constant 0 : index
    %c0_95 = arith.constant 0 : index
    %c128_96 = arith.constant 128 : index
    %66 = vector.load %arg13[%c0_94, %c0_95, %c128_96] : memref<2x16x1152xf32, #tpu.memory_space<vmem>>, vector<2x16x128xf32>
    tpu.vector_store %arg13[%c0_94, %c0_95, %c128_96], %65 {strides = array<i32>} : memref<2x16x1152xf32, #tpu.memory_space<vmem>>, vector<2x16x128xf32>,
    %c0_97 = arith.constant 0 : index
    %c0_98 = arith.constant 0 : index
    %c16 = arith.constant 16 : index
    %67 = vector.load %arg12[%c0_97, %c0_98, %c16] : memref<2x18x144xf32, #tpu.memory_space<vmem>>, vector<2x16x128xf32>
    %c0_99 = arith.constant 0 : index
    %c0_100 = arith.constant 0 : index
    %c256_101 = arith.constant 256 : index
    %68 = vector.load %arg13[%c0_99, %c0_100, %c256_101] : memref<2x16x1152xf32, #tpu.memory_space<vmem>>, vector<2x16x128xf32>
    tpu.vector_store %arg13[%c0_99, %c0_100, %c256_101], %67 {strides = array<i32>} : memref<2x16x1152xf32, #tpu.memory_space<vmem>>, vector<2x16x128xf32>,
    %c0_102 = arith.constant 0 : index
    %c1_103 = arith.constant 1 : index
    %c0_104 = arith.constant 0 : index
    %69 = vector.load %arg12[%c0_102, %c1_103, %c0_104] : memref<2x18x144xf32, #tpu.memory_space<vmem>>, vector<2x16x128xf32>
    %c0_105 = arith.constant 0 : index
    %c0_106 = arith.constant 0 : index
    %c384_107 = arith.constant 384 : index
    %70 = vector.load %arg13[%c0_105, %c0_106, %c384_107] : memref<2x16x1152xf32, #tpu.memory_space<vmem>>, vector<2x16x128xf32>
    tpu.vector_store %arg13[%c0_105, %c0_106, %c384_107], %69 {strides = array<i32>} : memref<2x16x1152xf32, #tpu.memory_space<vmem>>, vector<2x16x128xf32>,
    %c0_108 = arith.constant 0 : index
    %c1_109 = arith.constant 1 : index
    %c8_110 = arith.constant 8 : index
    %71 = vector.load %arg12[%c0_108, %c1_109, %c8_110] : memref<2x18x144xf32, #tpu.memory_space<vmem>>, vector<2x16x128xf32>
    %c0_111 = arith.constant 0 : index
    %c0_112 = arith.constant 0 : index
    %c512_113 = arith.constant 512 : index
    %72 = vector.load %arg13[%c0_111, %c0_112, %c512_113] : memref<2x16x1152xf32, #tpu.memory_space<vmem>>, vector<2x16x128xf32>
    tpu.vector_store %arg13[%c0_111, %c0_112, %c512_113], %71 {strides = array<i32>} : memref<2x16x1152xf32, #tpu.memory_space<vmem>>, vector<2x16x128xf32>,
    %c0_114 = arith.constant 0 : index
    %c1_115 = arith.constant 1 : index
    %c16_116 = arith.constant 16 : index
    %73 = vector.load %arg12[%c0_114, %c1_115, %c16_116] : memref<2x18x144xf32, #tpu.memory_space<vmem>>, vector<2x16x128xf32>
    %c0_117 = arith.constant 0 : index
    %c0_118 = arith.constant 0 : index
    %c640 = arith.constant 640 : index
    %74 = vector.load %arg13[%c0_117, %c0_118, %c640] : memref<2x16x1152xf32, #tpu.memory_space<vmem>>, vector<2x16x128xf32>
    tpu.vector_store %arg13[%c0_117, %c0_118, %c640], %73 {strides = array<i32>} : memref<2x16x1152xf32, #tpu.memory_space<vmem>>, vector<2x16x128xf32>,
    %c0_119 = arith.constant 0 : index
    %c2_120 = arith.constant 2 : index
    %c0_121 = arith.constant 0 : index
    %75 = vector.load %arg12[%c0_119, %c2_120, %c0_121] : memref<2x18x144xf32, #tpu.memory_space<vmem>>, vector<2x16x128xf32>
    %c0_122 = arith.constant 0 : index
    %c0_123 = arith.constant 0 : index
    %c768 = arith.constant 768 : index
    %76 = vector.load %arg13[%c0_122, %c0_123, %c768] : memref<2x16x1152xf32, #tpu.memory_space<vmem>>, vector<2x16x128xf32>
    tpu.vector_store %arg13[%c0_122, %c0_123, %c768], %75 {strides = array<i32>} : memref<2x16x1152xf32, #tpu.memory_space<vmem>>, vector<2x16x128xf32>,
    %c0_124 = arith.constant 0 : index
    %c2_125 = arith.constant 2 : index
    %c8_126 = arith.constant 8 : index
    %77 = vector.load %arg12[%c0_124, %c2_125, %c8_126] : memref<2x18x144xf32, #tpu.memory_space<vmem>>, vector<2x16x128xf32>
    %c0_127 = arith.constant 0 : index
    %c0_128 = arith.constant 0 : index
    %c896 = arith.constant 896 : index
    %78 = vector.load %arg13[%c0_127, %c0_128, %c896] : memref<2x16x1152xf32, #tpu.memory_space<vmem>>, vector<2x16x128xf32>
    tpu.vector_store %arg13[%c0_127, %c0_128, %c896], %77 {strides = array<i32>} : memref<2x16x1152xf32, #tpu.memory_space<vmem>>, vector<2x16x128xf32>,
    %c0_129 = arith.constant 0 : index
    %c2_130 = arith.constant 2 : index
    %c16_131 = arith.constant 16 : index
    %79 = vector.load %arg12[%c0_129, %c2_130, %c16_131] : memref<2x18x144xf32, #tpu.memory_space<vmem>>, vector<2x16x128xf32>
    %c0_132 = arith.constant 0 : index
    %c0_133 = arith.constant 0 : index
    %c1024 = arith.constant 1024 : index
    %80 = vector.load %arg13[%c0_132, %c0_133, %c1024] : memref<2x16x1152xf32, #tpu.memory_space<vmem>>, vector<2x16x128xf32>
    tpu.vector_store %arg13[%c0_132, %c0_133, %c1024], %79 {strides = array<i32>} : memref<2x16x1152xf32, #tpu.memory_space<vmem>>, vector<2x16x128xf32>,
    %c0_134 = arith.constant 0 : index
    %c0_135 = arith.constant 0 : index
    %c0_136 = arith.constant 0 : index
    %81 = vector.load %arg13[%c0_134, %c0_135, %c0_136] : memref<2x16x1152xf32, #tpu.memory_space<vmem>>, vector<2x16x1152xf32>
    %82 = vector.shape_cast %81 : vector<2x16x1152xf32> to vector<32x1152xf32>
    %c0_137 = arith.constant 0 : index
    %c0_138 = arith.constant 0 : index
    %83 = vector.load %arg2[%c0_137, %c0_138] : memref<1152x128xf32, #tpu.memory_space<vmem>>, vector<1152x128xf32>
    %cst_139 = arith.constant dense<0.000000e+00> : vector<32x128xf32>
    %84 = tpu.matmul %82, %83, %cst_139 {dimension_numbers = #tpu.dot_dimension_numbers<[1], [0], [0], [1], [0, 0, 1, 1], [], []>} : vector<32x1152xf32>, vector<1152x128xf32>, vector<32x128xf32> -> vector<32x128xf32>
    %cst_140 = arith.constant dense<0.000000e+00> : vector<128xf32>
    %85 = vector.multi_reduction <add>, %84, %cst_140 [0] : vector<32x128xf32> to vector<128xf32>
    %86 = vector.shape_cast %85 : vector<128xf32> to vector<1x128xf32>
    %87 = arith.mulf %84, %84 : vector<32x128xf32>
    %cst_141 = arith.constant dense<0.000000e+00> : vector<128xf32>
    %88 = vector.multi_reduction <add>, %87, %cst_141 [0] : vector<32x128xf32> to vector<128xf32>
    %89 = vector.shape_cast %88 : vector<128xf32> to vector<1x128xf32>
    %c0_142 = arith.constant 0 : index
    %c0_143 = arith.constant 0 : index
    %90 = vector.load %arg7[%c0_142, %c0_143] : memref<128x8xf32, #tpu.memory_space<vmem>>, vector<128x8xf32>
    %cst_144 = arith.constant dense<0.000000e+00> : vector<1x8xf32>
    %91 = tpu.matmul %86, %90, %cst_144 {dimension_numbers = #tpu.dot_dimension_numbers<[1], [0], [0], [1], [0, 0, 1, 1], [], []>} : vector<1x128xf32>, vector<128x8xf32>, vector<1x8xf32> -> vector<1x8xf32>
    %c0_145 = arith.constant 0 : index
    %c0_146 = arith.constant 0 : index
    %92 = vector.load %arg7[%c0_145, %c0_146] : memref<128x8xf32, #tpu.memory_space<vmem>>, vector<128x8xf32>
    %cst_147 = arith.constant dense<0.000000e+00> : vector<1x8xf32>
    %93 = tpu.matmul %89, %92, %cst_147 {dimension_numbers = #tpu.dot_dimension_numbers<[1], [0], [0], [1], [0, 0, 1, 1], [], []>} : vector<1x128xf32>, vector<128x8xf32>, vector<1x8xf32> -> vector<1x8xf32>
    %cst_148 = arith.constant 0.001953125 : f32
    %94 = vector.broadcast %cst_148 : f32 to vector<1x8xf32>
    %95 = arith.mulf %91, %94 : vector<1x8xf32>
    %cst_149 = arith.constant 0.001953125 : f32
    %96 = vector.broadcast %cst_149 : f32 to vector<1x8xf32>
    %97 = arith.mulf %93, %96 : vector<1x8xf32>
    %98 = arith.mulf %95, %95 : vector<1x8xf32>
    %99 = arith.subf %97, %98 : vector<1x8xf32>
    %c0_150 = arith.constant 0 : index
    %c0_151 = arith.constant 0 : index
    %100 = vector.load %arg5[%c0_150, %c0_151] : memref<1x8xf32, #tpu.memory_space<vmem>>, vector<1x8xf32>
    %cst_152 = arith.constant 9.99999974E-6 : f32
    %101 = vector.broadcast %cst_152 : f32 to vector<1x8xf32>
    %102 = arith.addf %99, %101 : vector<1x8xf32>
    %103 = math.rsqrt %102 : vector<1x8xf32>
    %104 = arith.mulf %100, %103 : vector<1x8xf32>
    %c0_153 = arith.constant 0 : index
    %c0_154 = arith.constant 0 : index
    %105 = vector.load %arg6[%c0_153, %c0_154] : memref<1x8xf32, #tpu.memory_space<vmem>>, vector<1x8xf32>
    %106 = arith.mulf %95, %104 : vector<1x8xf32>
    %107 = arith.subf %105, %106 : vector<1x8xf32>
    %c0_155 = arith.constant 0 : index
    %c0_156 = arith.constant 0 : index
    %108 = vector.load %arg8[%c0_155, %c0_156] : memref<8x128xf32, #tpu.memory_space<vmem>>, vector<8x128xf32>
    %cst_157 = arith.constant dense<0.000000e+00> : vector<1x128xf32>
    %109 = tpu.matmul %104, %108, %cst_157 {dimension_numbers = #tpu.dot_dimension_numbers<[1], [0], [0], [1], [0, 0, 1, 1], [], []>} : vector<1x8xf32>, vector<8x128xf32>, vector<1x128xf32> -> vector<1x128xf32>
    %c0_158 = arith.constant 0 : index
    %c0_159 = arith.constant 0 : index
    %110 = vector.load %arg8[%c0_158, %c0_159] : memref<8x128xf32, #tpu.memory_space<vmem>>, vector<8x128xf32>
    %cst_160 = arith.constant dense<0.000000e+00> : vector<1x128xf32>
    %111 = tpu.matmul %107, %110, %cst_160 {dimension_numbers = #tpu.dot_dimension_numbers<[1], [0], [0], [1], [0, 0, 1, 1], [], []>} : vector<1x8xf32>, vector<8x128xf32>, vector<1x128xf32> -> vector<1x128xf32>
    %112 = vector.broadcast %109 : vector<1x128xf32> to vector<32x128xf32>
    %113 = arith.mulf %84, %112 : vector<32x128xf32>
    %114 = vector.broadcast %111 : vector<1x128xf32> to vector<32x128xf32>
    %115 = arith.addf %113, %114 : vector<32x128xf32>
    %cst_161 = arith.constant 0.000000e+00 : f32
    %116 = vector.broadcast %cst_161 : f32 to vector<32x128xf32>
    %117 = arith.maximumf %115, %116 : vector<32x128xf32>
    %c0_162 = arith.constant 0 : index
    %c0_163 = arith.constant 0 : index
    %118 = vector.load %arg9[%c0_162, %c0_163] : memref<32x128xf32, #tpu.memory_space<vmem>>, vector<32x128xf32>
    tpu.vector_store %arg9[%c0_162, %c0_163], %117 {strides = array<i32>} : memref<32x128xf32, #tpu.memory_space<vmem>>, vector<32x128xf32>,
    return
  }
}

</mosaic_0001>

<bundles_post_ra>
// kernel: tile.19
= control target key start
LH: loop header
LB: loop body
LE: loop exit
PB: predicated region body
PF: predicated region fallthrough
CT: control target
= control target key end

     0   :  { %vm6_vm0 = vcmask 1043458   ;;  %vm10_vm1 = vcmask 1045508   ;;  %vm14_vm2 = vcmask 1047558   ;;  %s19_s6 = smov 3  ;;  %s22_s7 = smov 12  ;;  %vm16_vm3 = vcmask 64512   ;;  %s736_s0 = inlined_call_operand.vmem [shape: f32[8,16,8], index: 0, kind: input, shape index: {}]   ;;  %s737_s1 = inlined_call_operand.vmem [shape: f32[8,128], index: 1, kind: output, shape index: {}]  }
   0x1   :  { %v348_v0 = vld [vmem:[%s736_s0 + $0xf] ss:$16 sm:%s19_s6]   ;;  %s27_s12 = smov 48  ;;  %s32_s13 = smov 192  ;;  %vm38_vm4 = vcmask 1048512   ;;  %vm60_vm5 = vcmask 982912  }
   0x2   :  { %v349_v1 = vld [vmem:[%s736_s0 + $0xf] ss:$16 sm:%s22_s7]   ;;  %s63_s18 = smov 3  ;;  %s66_s21 = smov 12  ;;  %vm82_vm6 = vcmask 917312   ;;  %vm104_vm7 = vcmask 851712  }
   0x3   :  { %v25_v2 = vsel %vm6_vm0, %v349_v1, %v348_v0  ;;  %v350_v3 = vld [vmem:[%s736_s0 + $0xf] ss:$16 sm:%s27_s12]   ;;  %v356_v6 = vld [vmem:[%s736_s0 + $0xd] ss:$16 sm:%s63_s18]   ;;  %s71_s22 = smov 48  ;;  %s76_s27 = smov 192 }
   0x4   :  { %v351_v4 = vld [vmem:[%s736_s0 + $0xf] ss:$16 sm:%s32_s13]   ;;  %v30_v5 = vsel %vm10_vm1, %v350_v3, %v25_v2  ;;  %v357_v8 = vld [vmem:[%s736_s0 + $0xd] ss:$16 sm:%s66_s21]   ;;  %s423_s28 = smov 120   ;;  %s41_s2 = smov 3 }
   0x5   :  { %v35_v7 = vsel %vm14_vm2, %v351_v4, %v30_v5  ;;  %v358_v9 = vld [vmem:[%s736_s0 + $0xd] ss:$16 sm:%s71_s22]   ;;  %v69_v10 = vsel %vm6_vm0, %v357_v8, %v356_v6  ;;  %s44_s3 = smov 12  ;;  %v352_v13 = vld [vmem:[%s736_s0 + $0xe] ss:$16 sm:%s41_s2]   ;;  %s49_s8 = smov 48 }
   0x6   :  { %36 = vrot.lane.b32.xlu0 %v35_v7, %s423_s28  ;;  %v359_v11 = vld [vmem:[%s736_s0 + $0xd] ss:$16 sm:%s76_s27]   ;;  %v74_v12 = vsel %vm10_vm1, %v358_v9, %v69_v10  ;;  %s54_s9 = smov 192  ;;  %s85_s14 = smov 3  ;;  %vm126_vm8 = vcmask 786112   ;;  %vm148_vm9 = vcmask 720512  }
   0x7   :  { %v353_v14 = vld [vmem:[%s736_s0 + $0xe] ss:$16 sm:%s44_s3]   ;;  %v79_v15 = vsel %vm14_vm2, %v359_v11, %v74_v12  ;;  %s424_s15 = smov 104   ;;  %v360_v20 = vld [vmem:[%s736_s0 + $0xc] ss:$16 sm:%s85_s14]   ;;  %s88_s18 = smov 12 }
   0x8   :  { %v47_v16 = vsel %vm6_vm0, %v353_v14, %v352_v13  ;;  %v354_v17 = vld [vmem:[%s736_s0 + $0xe] ss:$16 sm:%s49_s8]   ;;  %80 = vrot.lane.b32.xlu1 %v79_v15, %s424_s15  ;;  %s93_s19 = smov 48  ;;  %s98_s24 = smov 192  ;;  %vm170_vm10 = vcmask 654912   ;;  %vm192_vm11 = vcmask 589312  }
   0x9   :  { %v355_v18 = vld [vmem:[%s736_s0 + $0xe] ss:$16 sm:%s54_s9]   ;;  %v52_v19 = vsel %vm10_vm1, %v354_v17, %v47_v16  ;;  %v361_v21 = vld [vmem:[%s736_s0 + $0xc] ss:$16 sm:%s88_s18]   ;;  %s151_s27 = smov 3  ;;  %s154_s28 = smov 12 }
   0xa   :  { %v362_v22 = vld [vmem:[%s736_s0 + $0xc] ss:$16 sm:%s93_s19]   ;;  %v57_v23 = vsel %vm14_vm2, %v355_v18, %v52_v19  ;;  %v91_v24 = vsel %vm6_vm0, %v361_v21, %v360_v20  ;;  %v372_v27 = vld [vmem:[%s736_s0 + $0x9] ss:$16 sm:%s151_s27]   ;;  %s159_s4 = smov 48  ;;  %s164_s7 = smov 192 }
   0xb   :  { %v363_v25 = vld [vmem:[%s736_s0 + $0xc] ss:$16 sm:%s98_s24]   ;;  %v96_v26 = vsel %vm10_vm1, %v362_v22, %v91_v24  ;;  %v373_v28 = vld [vmem:[%s736_s0 + $0x9] ss:$16 sm:%s154_s28]   ;;  %s173_s8 = smov 3  ;;  %s425_s9 = smov 112  }
   0xc   :  { %v157_v29 = vsel %vm6_vm0, %v373_v28, %v372_v27  ;;  %v374_v30 = vld [vmem:[%s736_s0 + $0x9] ss:$16 sm:%s159_s4]   ;;  %v101_v31 = vsel %vm14_vm2, %v363_v25, %v96_v26  ;;  %v376_v32 = vld [vmem:[%s736_s0 + $0x8] ss:$16 sm:%s173_s8]   ;;  %s176_s12 = smov 12  ;;  %s181_s13 = smov 48 }
   0xd   :  { %v377_v33 = vld [vmem:[%s736_s0 + $0x8] ss:$16 sm:%s176_s12]   ;;  %s186_s16 = smov 192  ;;  %v162_v34 = vsel %vm10_vm1, %v374_v30, %v157_v29  ;;  %v375_v35 = vld [vmem:[%s736_s0 + $0x9] ss:$16 sm:%s164_s7]   ;;  %s217_s21 = smov 3 }
   0xe   :  { %58 = vrot.lane.b32.xlu0 %v57_v23, %s425_s9  ;;  %v179_v36 = vsel %vm6_vm0, %v377_v33, %v376_v32  ;;  %v378_v37 = vld [vmem:[%s736_s0 + $0x8] ss:$16 sm:%s181_s13]   ;;  %s220_s22 = smov 12  ;;  %s426_s23 = smov 96   ;;  %v167_v40 = vsel %vm14_vm2, %v375_v35, %v162_v34  ;;  %vm214_vm12 = vcmask 523712   ;;  %vm236_vm13 = vcmask 458112  }
   0xf   :  { %s225_s24 = smov 48  ;;  %v384_v38 = vld [vmem:[%s736_s0 + $0x6] ss:$16 sm:%s217_s21]   ;;  %s239_s29 = smov 3  ;;  %v184_v41 = vsel %vm10_vm1, %v378_v37, %v179_v36  ;;  %v379_v42 = vld [vmem:[%s736_s0 + $0x8] ss:$16 sm:%s186_s16]  }
  0x10   :  { %102 = vrot.lane.b32.xlu1 %v101_v31, %s426_s23  ;;  %v385_v39 = vld [vmem:[%s736_s0 + $0x6] ss:$16 sm:%s220_s22]   ;;  %s230_s3 = smov 192  ;;  %s242_s4 = smov 12  ;;  %v189_v47 = vsel %vm14_vm2, %v379_v42, %v184_v41  ;;  %vm258_vm14 = vcmask 392512   ;;  %vm280_vm15 = vcmask 326912  }
  0x11   :  { %v386_v43 = vld [vmem:[%s736_s0 + $0x6] ss:$16 sm:%s225_s24]   ;;  %s247_s7 = smov 48  ;;  %v223_v44 = vsel %vm6_vm0, %v385_v39, %v384_v38  ;;  %v388_v45 = vld [vmem:[%s736_s0 + $0x5] ss:$16 sm:%s239_s29]   ;;  %s107_s12 = smov 3 }
  0x12   :  { %v389_v46 = vld [vmem:[%s736_s0 + $0x5] ss:$16 sm:%s242_s4]   ;;  %s110_s13 = smov 12  ;;  %s427_s14 = smov 72   ;;  %v387_v48 = vld [vmem:[%s736_s0 + $0x6] ss:$16 sm:%s230_s3]   ;;  %v228_v52 = vsel %vm10_vm1, %v386_v43, %v223_v44 }
  0x13   :  { %v364_v49 = vld [vmem:[%s736_s0 + $0xb] ss:$16 sm:%s107_s12]   ;;  %s115_s19 = smov 48  ;;  %s120_s20 = smov 192  ;;  %v245_v53 = vsel %vm6_vm0, %v389_v46, %v388_v45  ;;  %v390_v54 = vld [vmem:[%s736_s0 + $0x5] ss:$16 sm:%s247_s7]   ;;  %v233_v61 = vsel %vm14_vm2, %v387_v48, %v228_v52 }
  0x14   :  { %s252_s21 = smov 192  ;;  %v365_v50 = vld [vmem:[%s736_s0 + $0xb] ss:$16 sm:%s110_s13]   ;;  %s283_s26 = smov 3  ;;  %v250_v62 = vsel %vm10_vm1, %v390_v54, %v245_v53 }
  0x15   :  { %v366_v51 = vld [vmem:[%s736_s0 + $0xb] ss:$16 sm:%s115_s19]   ;;  %v113_v55 = vsel %vm6_vm0, %v365_v50, %v364_v49  ;;  %s286_s2 = smov 12  ;;  %s428_s3 = smov 64   ;;  %v396_v59 = vld [vmem:[%s736_s0 + $0x3] ss:$16 sm:%s283_s26]  }
  0x16   :  { %168 = vrot.lane.b32.xlu0 %v167_v40, %s427_s14  ;;  %v367_v56 = vld [vmem:[%s736_s0 + $0xb] ss:$16 sm:%s120_s20]   ;;  %v118_v57 = vsel %vm10_vm1, %v366_v51, %v113_v55  ;;  %s291_s4 = smov 48  ;;  %s305_s9 = smov 3 }
  0x17   :  { %v123_v58 = vsel %vm14_vm2, %v367_v56, %v118_v57  ;;  %v397_v60 = vld [vmem:[%s736_s0 + $0x3] ss:$16 sm:%s286_s2]   ;;  %s308_s10 = smov 12  ;;  %v391_v63 = vld [vmem:[%s736_s0 + $0x5] ss:$16 sm:%s252_s21]   ;;  %s429_s13 = smov 88  }
  0x18   :  { %190 = vrot.lane.b32.xlu1 %v189_v47, %s428_s3  ;;  %124 = vrot.lane.b32.xlu2 %v123_v58, %s429_s13  ;;  %s296_s14 = smov 192  ;;  %s313_s15 = smov 48  ;;  %v398_v0 = vld [vmem:[%s736_s0 + $0x3] ss:$16 sm:%s291_s4]   ;;  %v289_v2 = vsel %vm6_vm0, %v397_v60, %v396_v59  ;;  %v255_v5 = vsel %vm14_vm2, %v391_v63, %v250_v62 }
  0x19   :  { %v400_v1 = vld [vmem:[%s736_s0 + $0x2] ss:$16 sm:%s305_s9]   ;;  %s129_s20 = smov 3  ;;  %s132_s25 = smov 12  ;;  %v399_v6 = vld [vmem:[%s736_s0 + $0x3] ss:$16 sm:%s296_s14]   ;;  %v294_v12 = vsel %vm10_vm1, %v398_v0, %v289_v2 }
  0x1a   :  { %v401_v3 = vld [vmem:[%s736_s0 + $0x2] ss:$16 sm:%s308_s10]   ;;  %v368_v4 = vld [vmem:[%s736_s0 + $0xa] ss:$16 sm:%s129_s20]   ;;  %s137_s26 = smov 48  ;;  %s430_s27 = smov 48   ;;  %v299_v20 = vsel %vm14_vm2, %v399_v6, %v294_v12 }
  0x1b   :  { %v402_v7 = vld [vmem:[%s736_s0 + $0x2] ss:$16 sm:%s313_s15]   ;;  %s318_s3 = smov 192  ;;  %v369_v8 = vld [vmem:[%s736_s0 + $0xa] ss:$16 sm:%s132_s25]   ;;  %s142_s6 = smov 192  ;;  %v311_v13 = vsel %vm6_vm0, %v401_v3, %v400_v1 }
  0x1c   :  { %v135_v9 = vsel %vm6_vm0, %v369_v8, %v368_v4  ;;  %v370_v10 = vld [vmem:[%s736_s0 + $0xa] ss:$16 sm:%s137_s26]   ;;  %s195_s11 = smov 3  ;;  %s198_s12 = smov 12  ;;  %v316_v21 = vsel %vm10_vm1, %v402_v7, %v311_v13  ;;  %v403_v22 = vld [vmem:[%s736_s0 + $0x2] ss:$16 sm:%s318_s3]  }
  0x1d   :  { %v371_v11 = vld [vmem:[%s736_s0 + $0xa] ss:$16 sm:%s142_s6]   ;;  %v140_v14 = vsel %vm10_vm1, %v370_v10, %v135_v9  ;;  %v380_v15 = vld [vmem:[%s736_s0 + $0x7] ss:$16 sm:%s195_s11]   ;;  %s203_s17 = smov 48  ;;  %s431_s18 = smov 40   ;;  %v321_v25 = vsel %vm14_vm2, %v403_v22, %v316_v21 }
  0x1e   :  { %234 = vrot.lane.b32.xlu0 %v233_v61, %s430_s27  ;;  %v381_v16 = vld [vmem:[%s736_s0 + $0x7] ss:$16 sm:%s198_s12]   ;;  %v145_v17 = vsel %vm14_vm2, %v371_v11, %v140_v14  ;;  %s208_s21 = smov 192  ;;  %s432_s24 = smov 80  }
  0x1f   :  { %v201_v18 = vsel %vm6_vm0, %v381_v16, %v380_v15  ;;  %v382_v19 = vld [vmem:[%s736_s0 + $0x7] ss:$16 sm:%s203_s17]   ;;  %s261_s25 = smov 3  ;;  %s264_s26 = smov 12 }
  0x20   :  { %256 = vrot.lane.b32.xlu1 %v255_v5, %s431_s18  ;;  %146 = vrot.lane.b32.xlu2 %v145_v17, %s432_s24  ;;  %v206_v23 = vsel %vm10_vm1, %v382_v19, %v201_v18  ;;  %v383_v24 = vld [vmem:[%s736_s0 + $0x7] ss:$16 sm:%s208_s21]   ;;  %s433_s29 = smov 24   ;;  %s269_s5 = smov 48 }
  0x21   :  { %v392_v26 = vld [vmem:[%s736_s0 + $0x4] ss:$16 sm:%s261_s25]   ;;  %v211_v28 = vsel %vm14_vm2, %v383_v24, %v206_v23  ;;  %s434_s6 = smov 16   ;;  %s274_s9 = smov 192 }
  0x22   :  { %v393_v27 = vld [vmem:[%s736_s0 + $0x4] ss:$16 sm:%s264_s26]   ;;  %s435_s10 = smov 56   ;;  %s327_s11 = smov 3 }
  0x23   :  { %v267_v29 = vsel %vm6_vm0, %v393_v27, %v392_v26  ;;  %v394_v30 = vld [vmem:[%s736_s0 + $0x4] ss:$16 sm:%s269_s5]   ;;  %s330_s12 = smov 12  ;;  %v404_v33 = vld [vmem:[%s736_s0 + $0x1] ss:$16 sm:%s327_s11]   ;;  %s335_s19 = smov 48 }
  0x24   :  { %v272_v31 = vsel %vm10_vm1, %v394_v30, %v267_v29  ;;  %v395_v32 = vld [vmem:[%s736_s0 + $0x4] ss:$16 sm:%s274_s9]   ;;  %v405_v34 = vld [vmem:[%s736_s0 + $0x1] ss:$16 sm:%s330_s12]   ;;  %s340_s22 = smov 192  ;;  %s436_s23 = smov 32  }
  0x25   :  { %v277_v35 = vsel %vm14_vm2, %v395_v32, %v272_v31  ;;  %v333_v36 = vsel %vm6_vm0, %v405_v34, %v404_v33  ;;  %v406_v37 = vld [vmem:[%s736_s0 + $0x1] ss:$16 sm:%s335_s19]   ;;  %s437_s26 = smov 8   ;;  %s2_s27 = smov 3 }
  0x26   :  { %300 = vrot.lane.b32.xlu0 %v299_v20, %s433_s29  ;;  %v338_v38 = vsel %vm10_vm1, %v406_v37, %v333_v36  ;;  %v407_v39 = vld [vmem:[%s736_s0 + $0x1] ss:$16 sm:%s340_s22]   ;;  %s4_s28 = smov 12  ;;  %s8_s29 = smov 48 }
  0x27   :  { %v343_v40 = vsel %vm14_vm2, %v407_v39, %v338_v38  ;;  %s12_s30 = smov 192  ;;  %v3_v41 = vld [vmem:[%s736_s0] ss:$16 sm:%s2_s27]  }
  0x28   :  { %322 = vrot.lane.b32.xlu1 %v321_v25, %s434_s6  ;;  %212 = vrot.lane.b32.xlu2 %v211_v28, %s435_s10  ;;  %v5_v42 = vld [vmem:[%s736_s0] ss:$16 sm:%s4_s28]  }
  0x29   :  { %v7_v43 = vsel %vm6_vm0, %v5_v42, %v3_v41  ;;  %v9_v44 = vld [vmem:[%s736_s0] ss:$16 sm:%s8_s29]   ;;  %vm302_vm0 = vcmask 261312  }
  0x2a   :  { %v11_v45 = vsel %vm10_vm1, %v9_v44, %v7_v43  ;;  %v13_v46 = vld [vmem:[%s736_s0] ss:$16 sm:%s12_s30]   ;;  %vm324_vm1 = vcmask 195712  }
  0x2b   :  { %v15_v47 = vsel %vm14_vm2, %v13_v46, %v11_v45  ;;  %vm346_vm2 = vcmask 130112  }
  0x2c   :  { %17 = vst.msk [vmem:[%s737_s1] sm:$0xff] %vm16_vm3, %v15_v47  }
  0x30   :  { %278 = vrot.lane.b32.xlu2 %v277_v35, %s436_s23 }
  0x38   :  { %344 = vrot.lane.b32.xlu2 %v343_v40, %s437_s26 }
  0x72   :  { %v125_v48 = vpop.permute.xlu2 %124  }
  0x78   :  { %v37_v49 = vpop.permute.xlu0 %36  }
  0x79   :  { %39 = vst.msk [vmem:[%s737_s1] sm:$0xff] %vm38_vm4, %v37_v49  }
  0x7a   :  { %v81_v50 = vpop.permute.xlu1 %80   ;;  %v147_v51 = vpop.permute.xlu2 %146  }
  0x80   :  { %v59_v52 = vpop.permute.xlu0 %58  }
  0x81   :  { %61 = vst.msk [vmem:[%s737_s1] sm:$0xff] %vm60_vm5, %v59_v52  }
  0x82   :  { %83 = vst.msk [vmem:[%s737_s1] sm:$0xff] %vm82_vm6, %v81_v50   ;;  %v103_v53 = vpop.permute.xlu1 %102   ;;  %v213_v54 = vpop.permute.xlu2 %212  }
  0x83   :  { %105 = vst.msk [vmem:[%s737_s1] sm:$0xff] %vm104_vm7, %v103_v53  }
  0x84   :  { %127 = vst.msk [vmem:[%s737_s1] sm:$0xff] %vm126_vm8, %v125_v48  }
  0x85   :  { %149 = vst.msk [vmem:[%s737_s1] sm:$0xff] %vm148_vm9, %v147_v51  }
  0x88   :  { %v169_v55 = vpop.permute.xlu0 %168  }
  0x89   :  { %171 = vst.msk [vmem:[%s737_s1] sm:$0xff] %vm170_vm10, %v169_v55  }
  0x8a   :  { %v191_v56 = vpop.permute.xlu1 %190   ;;  %v279_v57 = vpop.permute.xlu2 %278  }
  0x8b   :  { %193 = vst.msk [vmem:[%s737_s1] sm:$0xff] %vm192_vm11, %v191_v56  }
  0x8c   :  { %215 = vst.msk [vmem:[%s737_s1] sm:$0xff] %vm214_vm12, %v213_v54  }
  0x90   :  { %v235_v58 = vpop.permute.xlu0 %234  }
  0x91   :  { %237 = vst.msk [vmem:[%s737_s1] sm:$0xff] %vm236_vm13, %v235_v58  }
  0x92   :  { %v257_v59 = vpop.permute.xlu1 %256   ;;  %v345_v60 = vpop.permute.xlu2 %344  }
  0x93   :  { %259 = vst.msk [vmem:[%s737_s1] sm:$0xff] %vm258_vm14, %v257_v59  }
  0x94   :  { %281 = vst.msk [vmem:[%s737_s1] sm:$0xff] %vm280_vm15, %v279_v57  }
  0x98   :  { %v301_v61 = vpop.permute.xlu0 %300  }
  0x99   :  { %303 = vst.msk [vmem:[%s737_s1] sm:$0xff] %vm302_vm0, %v301_v61  }
  0x9a   :  { %v323_v62 = vpop.permute.xlu1 %322  }
  0x9b   :  { %325 = vst.msk [vmem:[%s737_s1] sm:$0xff] %vm324_vm1, %v323_v62  }
  0x9c   :  { %347 = vst.msk [vmem:[%s737_s1] sm:$0xff] %vm346_vm2, %v345_v60  }

// kernel: _conv_block_forward_impl.1
= control target key start
LH: loop header
LB: loop body
LE: loop exit
PB: predicated region body
PF: predicated region fallthrough
CT: control target
= control target key end

     0   :  { %vm32_vm0 = vcmask 588800   ;;  %v1919_v2 = vmov 0.0   ;;  %s1920_s13 = smov 4   ;;  %vm35_vm1 = vcmask 582656   ;;  %vm60_vm2 = vcmask 556064   ;;  %s1922_s18 = smov 124   ;;  %s3082_s0 = inlined_call_operand.vmem [shape: f32[2,16,64], index: 0, kind: input, shape index: {}]   ;;  %s3083_s1 = inlined_call_operand.vmem [shape: f32[576,128], index: 1, kind: input, shape index: {}]   ;;  %s3084_s7 = inlined_call_operand.vmem [shape: f32[128,8], index: 7, kind: input, shape index: {}]   ;;  %s3085_s8 = inlined_call_operand.vmem [shape: f32[8,128], index: 8, kind: input, shape index: {}]   ;;  %s3086_s3 = inlined_call_operand.vmem [shape: f32[1,8], index: 3, kind: input, shape index: {}]   ;;  %s3087_s4 = inlined_call_operand.vmem [shape: f32[1,8], index: 4, kind: input, shape index: {}]   ;;  %s3088_s2 = inlined_call_operand.vmem [shape: f32[1152,128], index: 2, kind: input, shape index: {}]   ;;  %s3089_s5 = inlined_call_operand.vmem [shape: f32[1,8], index: 5, kind: input, shape index: {}]   ;;  %s3090_s6 = inlined_call_operand.vmem [shape: f32[1,8], index: 6, kind: input, shape index: {}]   ;;  %s3091_s9 = inlined_call_operand.vmem [shape: f32[32,128], index: 9, kind: output, shape index: {}]  }
   0x1   :  { %v42_v0 = vld [vmem:[%s3082_s0 + $0x10] sm:$0xff]  ;;  %v40_v1 = vld [vmem:[%s3082_s0] sm:$0xff]  ;;  %37 = vst.msk [vmem:[#allocation2 + $0x18] sm:$0xff] %vm32_vm0, %v1919_v2  ;;  %v43_v3 = vld [vmem:[%s3082_s0 + $0x18] sm:$0xff]  ;;  %vm69_vm3 = vcmask 523264   ;;  %s1923_s19 = smov 64  }
   0x2   :  { %52 = vrot.lane.b32.xlu1 %v42_v0, %s1920_s13  ;;  %48 = vrot.lane.b32.xlu0 %v40_v1, %s1920_s13  ;;  %38 = vst.msk [vmem:[#allocation2 + $0x20] sm:$0xff] %vm32_vm0, %v1919_v2  ;;  %v41_v4 = vld [vmem:[%s3082_s0 + $0x8] sm:$0xff]  ;;  %s1921_s0 = smov 60   ;;  %s1924_s20 = smov 56   ;;  %v286_v20 = vld [vmem:[%s3083_s1 + $0x78] sm:$0xff]  ;;  %vm94_vm4 = vcmask 1048064  }
   0x3   :  { %33 = vst.msk [vmem:[#allocation2] sm:$0xff] %vm32_vm0, %v1919_v2  ;;  %s1925_s21 = smov 120   ;;  %v285_v21 = vld [vmem:[%s3083_s1 + $0x70] sm:$0xff]  ;;  %355 = vmatpush.msra.mxu0 %v286_v20  ;;  %v284_v22 = vld [vmem:[%s3083_s1 + $0x68] sm:$0xff]  ;;  %v283_v23 = vld [vmem:[%s3083_s1 + $0x60] sm:$0xff]  ;;  %vm599_vm8 = vcmask 64512  }
   0x4   :  { %34 = vst.msk [vmem:[#allocation2 + $0x8] sm:$0xff] %vm32_vm0, %v1919_v2  ;;  %v282_v24 = vld [vmem:[%s3083_s1 + $0x58] sm:$0xff]  ;;  %v281_v25 = vld [vmem:[%s3083_s1 + $0x50] sm:$0xff]  ;;  %v280_v26 = vld [vmem:[%s3083_s1 + $0x48] sm:$0xff]  ;;  %vm661_vm9 = vcmask 130048   ;;  %vm678_vm10 = vcmask 1040384  }
   0x5   :  { %660 = vst [vmem:[#allocation4] sm:$0xff] %v1919_v2  ;;  %356 = vmatpush.msra.mxu0 %v285_v21  ;;  %v279_v27 = vld [vmem:[%s3083_s1 + $0x40] sm:$0xff]  ;;  %v278_v29 = vld [vmem:[%s3083_s1 + $0x38] sm:$0xff]  ;;  %v277_v30 = vld [vmem:[%s3083_s1 + $0x30] sm:$0xff]  ;;  %s1926_s15 = smov 8   ;;  %vm666_vm11 = vcmask 123904  }
   0x6   :  { %663 = vst [vmem:[#allocation4 + $0x10] sm:$0xff] %v1919_v2  ;;  %v276_v31 = vld [vmem:[%s3083_s1 + $0x28] sm:$0xff]  ;;  %v275_v32 = vld [vmem:[%s3083_s1 + $0x20] sm:$0xff]  ;;  %v274_v33 = vld [vmem:[%s3083_s1 + $0x18] sm:$0xff]  ;;  %vm703_vm12 = vcmask 1047617   ;;  %vm705_vm13 = vcmask 64513  }
   0x7   :  { %665 = vst [vmem:[#allocation4 + $0x20] sm:$0x3] %v1919_v2  ;;  %357 = vmatpush.msra.mxu0 %v284_v22  ;;  %v318_v34 = vld [vmem:[%s3083_s1 + $0x178] sm:$0xff]  ;;  %v273_v35 = vld [vmem:[%s3083_s1 + $0x10] sm:$0xff]  ;;  %v272_v37 = vld [vmem:[%s3083_s1 + $0x8] sm:$0xff]  ;;  %vm710_vm14 = vcmask 1040448  }
   0x8   :  { %668 = vst [vmem:[#allocation4 + $0x30] sm:$0xff] %v1919_v2  ;;  %413 = vmatpush.msra.mxu2 %v318_v34  ;;  %v317_v36 = vld [vmem:[%s3083_s1 + $0x170] sm:$0xff]  ;;  %v316_v38 = vld [vmem:[%s3083_s1 + $0x168] sm:$0xff]  ;;  %v271_v39 = vld [vmem:[%s3083_s1] sm:$0xff]  ;;  %vm712_vm15 = vcmask 57344   ;;  %s1927_s30 = smov 112  }
   0x9   :  { %670 = vst [vmem:[#allocation4 + $0x40] sm:$0xff] %v1919_v2  ;;  %358 = vmatpush.msra.mxu0 %v283_v23  ;;  %v315_v40 = vld [vmem:[%s3083_s1 + $0x160] sm:$0xff]  ;;  %v334_v41 = vld [vmem:[%s3083_s1 + $0x1f8] sm:$0xff]  ;;  %v333_v43 = vld [vmem:[%s3083_s1 + $0x1f0] sm:$0xff]  ;;  %vm707_vm0 = vcmask 1047616  }
   0xa   :  { %54 = vrot.lane.b32.xlu1 %v43_v3, %s1920_s13  ;;  %50 = vrot.lane.b32.xlu0 %v41_v4, %s1920_s13  ;;  %672 = vst [vmem:[#allocation4 + $0x50] sm:$0x3] %v1919_v2  ;;  %v314_v42 = vld [vmem:[%s3083_s1 + $0x158] sm:$0xff]  ;;  %v313_v44 = vld [vmem:[%s3083_s1 + $0x150] sm:$0xff] }
   0xb   :  { %39 = vst.msk [vmem:[#allocation2 + $0x28] sm:$0x3] %vm35_vm1, %v1919_v2  ;;  %359 = vmatpush.msra.mxu0 %v282_v24  ;;  %414 = vmatpush.msra.mxu2 %v317_v36  ;;  %v332_v45 = vld [vmem:[%s3083_s1 + $0x1e8] sm:$0xff]  ;;  %v331_v47 = vld [vmem:[%s3083_s1 + $0x1e0] sm:$0xff]  ;;  %v302_v49 = vld [vmem:[%s3083_s1 + $0xf8] sm:$0xff] }
   0xc   :  { %36 = vst.msk [vmem:[#allocation2 + $0x10] sm:$0x3] %vm35_vm1, %v1919_v2  ;;  %442 = vmatpush.msra.mxu3 %v334_v41  ;;  %v312_v46 = vld [vmem:[%s3083_s1 + $0x148] sm:$0xff]  ;;  %v311_v48 = vld [vmem:[%s3083_s1 + $0x140] sm:$0xff]  ;;  %v330_v50 = vld [vmem:[%s3083_s1 + $0x1d8] sm:$0xff]  ;;  %384 = vmatpush.msra.mxu1 %v302_v49  ;;  %vm830_vm1 = vcmask 1046528  }
   0xd   :  { %360 = vmatpush.msra.mxu0 %v281_v25  ;;  %415 = vmatpush.msra.mxu2 %v316_v38  ;;  %v310_v51 = vld [vmem:[%s3083_s1 + $0x138] sm:$0xff]  ;;  %v301_v52 = vld [vmem:[%s3083_s1 + $0xf0] sm:$0xff]  ;;  %v300_v55 = vld [vmem:[%s3083_s1 + $0xe8] sm:$0xff]  ;;  %662 = vst.msk [vmem:[#allocation4 + $0x8] sm:$0xff] %vm661_vm9, %v1919_v2 }
   0xe   :  { %443 = vmatpush.msra.mxu3 %v333_v43  ;;  %v329_v53 = vld [vmem:[%s3083_s1 + $0x1d0] sm:$0xff]  ;;  %385 = vmatpush.msra.mxu1 %v301_v52  ;;  %v328_v56 = vld [vmem:[%s3083_s1 + $0x1c8] sm:$0xff]  ;;  %v299_v58 = vld [vmem:[%s3083_s1 + $0xe0] sm:$0xff]  ;;  %664 = vst.msk [vmem:[#allocation4 + $0x18] sm:$0xff] %vm661_vm9, %v1919_v2 }
   0xf   :  { %361 = vmatpush.msra.mxu0 %v280_v26  ;;  %416 = vmatpush.msra.mxu2 %v315_v40  ;;  %v309_v54 = vld [vmem:[%s3083_s1 + $0x130] sm:$0xff]  ;;  %v308_v57 = vld [vmem:[%s3083_s1 + $0x128] sm:$0xff]  ;;  %v327_v59 = vld [vmem:[%s3083_s1 + $0x1c0] sm:$0xff]  ;;  %669 = vst.msk [vmem:[#allocation4 + $0x38] sm:$0xff] %vm661_vm9, %v1919_v2 }
  0x10   :  { %444 = vmatpush.msra.mxu3 %v332_v45  ;;  %386 = vmatpush.msra.mxu1 %v300_v55  ;;  %v307_v60 = vld [vmem:[%s3083_s1 + $0x120] sm:$0xff]  ;;  %v298_v61 = vld [vmem:[%s3083_s1 + $0xd8] sm:$0xff]  ;;  %v297_v0 = vld [vmem:[%s3083_s1 + $0xd0] sm:$0xff]  ;;  %671 = vst.msk [vmem:[#allocation4 + $0x48] sm:$0xff] %vm661_vm9, %v1919_v2 }
  0x11   :  { %362 = vmatpush.msra.mxu0 %v279_v27  ;;  %417 = vmatpush.msra.mxu2 %v314_v42  ;;  %v326_v62 = vld [vmem:[%s3083_s1 + $0x1b8] sm:$0xff]  ;;  %v325_v1 = vld [vmem:[%s3083_s1 + $0x1b0] sm:$0xff]  ;;  %v296_v4 = vld [vmem:[%s3083_s1 + $0xc8] sm:$0xff] }
  0x12   :  { %445 = vmatpush.msra.mxu3 %v331_v47  ;;  %387 = vmatpush.msra.mxu1 %v299_v58  ;;  %v306_v63 = vld [vmem:[%s3083_s1 + $0x118] sm:$0xff]  ;;  %v305_v3 = vld [vmem:[%s3083_s1 + $0x110] sm:$0xff]  ;;  %v288_v25 = vld [vmem:[%s3083_s1 + $0x88] sm:$0xff] }
  0x13   :  { %363 = vmatpush.msra.mxu0 %v278_v29  ;;  %418 = vmatpush.msra.mxu2 %v313_v44  ;;  %v290_v21 = vld [vmem:[%s3083_s1 + $0x98] sm:$0xff]  ;;  %v289_v23 = vld [vmem:[%s3083_s1 + $0x90] sm:$0xff]  ;;  %v340_v26 = vld [vmem:[%s3083_s1 + $0x228] sm:$0xff] }
  0x14   :  { %446 = vmatpush.msra.mxu3 %v330_v50  ;;  %388 = vmatpush.msra.mxu1 %v298_v61  ;;  %v342_v22 = vld [vmem:[%s3083_s1 + $0x238] sm:$0xff]  ;;  %v341_v24 = vld [vmem:[%s3083_s1 + $0x230] sm:$0xff]  ;;  %v287_v27 = vld [vmem:[%s3083_s1 + $0x80] sm:$0xff] }
  0x15   :  { %364 = vmatpush.msra.mxu0 %v277_v30  ;;  %419 = vmatpush.msra.mxu2 %v312_v46  ;;  %v1212_v2 = vld [vmem:[%s3088_s2 + $0x40] sm:$0xff] }
  0x16   :  { %447 = vmatpush.msra.mxu3 %v329_v53  ;;  %389 = vmatpush.msra.mxu1 %v297_v0 }
  0x17   :  { %365 = vmatpush.msra.mxu0 %v276_v31  ;;  %420 = vmatpush.msra.mxu2 %v311_v48  ;;  %v338_v31 = vld [vmem:[%s3083_s1 + $0x218] sm:$0xff] }
  0x18   :  { %448 = vmatpush.msra.mxu3 %v328_v56  ;;  %390 = vmatpush.msra.mxu1 %v296_v4 }
  0x19   :  { %366 = vmatpush.msra.mxu0 %v275_v32  ;;  %421 = vmatpush.msra.mxu2 %v310_v51  ;;  %v337_v32 = vld [vmem:[%s3083_s1 + $0x210] sm:$0xff] }
  0x1a   :  { %449 = vmatpush.msra.mxu3 %v327_v59 }
  0x1b   :  { %367 = vmatpush.msra.mxu0 %v274_v33  ;;  %422 = vmatpush.msra.mxu2 %v309_v54  ;;  %v336_v33 = vld [vmem:[%s3083_s1 + $0x208] sm:$0xff] }
  0x1c   :  { %450 = vmatpush.msra.mxu3 %v326_v62 }
  0x1d   :  { %368 = vmatpush.msra.mxu0 %v273_v35  ;;  %423 = vmatpush.msra.mxu2 %v308_v57  ;;  %v335_v35 = vld [vmem:[%s3083_s1 + $0x200] sm:$0xff] }
  0x1e   :  { %451 = vmatpush.msra.mxu3 %v325_v1 }
  0x1f   :  { %369 = vmatpush.msra.mxu0 %v272_v37  ;;  %424 = vmatpush.msra.mxu2 %v307_v60 }
  0x21   :  { %370 = vmatpush.msra.mxu0 %v271_v39  ;;  %425 = vmatpush.msra.mxu2 %v306_v63 }
  0x23   :  { %426 = vmatpush.msra.mxu2 %v305_v3  ;;  %479 = vmatpush.msrb.mxu0 %v342_v22 }
  0x25   :  { %480 = vmatpush.msrb.mxu0 %v341_v24  ;;  %v533_v24 = vld [vmem:[%s3084_s7 + $0x58] sm:$0xff] }
  0x27   :  { %481 = vmatpush.msrb.mxu0 %v340_v26  ;;  %v531_v26 = vld [vmem:[%s3084_s7 + $0x48] sm:$0xff] }
  0x74   :  { %v53_v5 = vpop.permute.xlu1 %52  ;;  %v49_v6 = vpop.permute.xlu0 %48 }
  0x75   :  { %63 = vst.msk [vmem:[#allocation2 + $0x19] sm:$0xff] %vm60_vm2, %v53_v5  ;;  %v324_v5 = vld [vmem:[%s3083_s1 + $0x1a8] sm:$0xff] }
  0x76   :  { %61 = vst.msk [vmem:[#allocation2 + $0x1] sm:$0xff] %vm60_vm2, %v49_v6  ;;  %v304_v6 = vld [vmem:[%s3083_s1 + $0x108] sm:$0xff]  ;;  %452 = vmatpush.msra.mxu3 %v324_v5 }
  0x77   :  { %427 = vmatpush.msra.mxu2 %v304_v6 }
  0x7c   :  { %v55_v7 = vpop.permute.xlu1 %54  ;;  %v51_v8 = vpop.permute.xlu0 %50  ;;  %v2002_v9 = vld [vmem:[#allocation2 + $0x18] sm:$0xff] }
  0x7d   :  { %64 = vst.msk [vmem:[#allocation2 + $0x21] sm:$0xff] %vm60_vm2, %v55_v7  ;;  %86 = vrot.lane.b32.xlu0 %v2002_v9, %s1921_s0  ;;  %v147_v10 = vld [vmem:[#allocation2 + $0x1] sm:$0xff]  ;;  %v149_v19 = vld [vmem:[#allocation2 + $0x19] sm:$0xff] }
  0x7e   :  { %v74_v11 = vld [vmem:[#allocation2] sm:$0xff]  ;;  %62 = vst.msk [vmem:[#allocation2 + $0x9] sm:$0xff] %vm60_vm2, %v51_v8  ;;  %155 = vrot.lane.b32.xlu1 %v147_v10, %s1922_s18  ;;  %vm1005_vm2 = vcmask 1045504  }
  0x7f   :  { %82 = vrot.lane.b32.xlu2 %v74_v11, %s1921_s0  ;;  %70 = vst.msk [vmem:[#allocation3] sm:$0xff] %vm69_vm3, %v74_v11  ;;  %v295_v7 = vld [vmem:[%s3083_s1 + $0xc0] sm:$0xff] }
  0x80   :  { %72 = vst.msk [vmem:[#allocation3 + $0x50] sm:$0xff] %vm69_vm3, %v2002_v9  ;;  %v323_v8 = vld [vmem:[%s3083_s1 + $0x1a0] sm:$0xff]  ;;  %391 = vmatpush.msra.mxu1 %v295_v7 }
  0x81   :  { %453 = vmatpush.msra.mxu3 %v323_v8 }
  0x84   :  { %v2011_v12 = vld [vmem:[#allocation2 + $0x20] sm:$0xff] }
  0x85   :  { %88 = vrot.lane.b32.xlu0 %v2011_v12, %s1921_s0  ;;  %v203_v13 = vld [vmem:[#allocation2 + $0x2] sm:$0xff]  ;;  %73 = vst.msk [vmem:[#allocation3 + $0x78] sm:$0xff] %vm69_vm3, %v2011_v12  ;;  %v204_v15 = vld [vmem:[#allocation2 + $0xa] sm:$0xff]  ;;  %v205_v16 = vld [vmem:[#allocation2 + $0x1a] sm:$0xff] }
  0x86   :  { %v75_v14 = vld [vmem:[#allocation2 + $0x8] sm:$0xff]  ;;  %211 = vrot.lane.b32.xlu1 %v203_v13, %s1921_s0  ;;  %199 = vst.msk [vmem:[#allocation3 + $0x18] sm:$0xff] %vm69_vm3, %v203_v13 }
  0x87   :  { %84 = vrot.lane.b32.xlu2 %v75_v14, %s1921_s0  ;;  %71 = vst.msk [vmem:[#allocation3 + $0x28] sm:$0xff] %vm69_vm3, %v75_v14  ;;  %v2020_v17 = vld [vmem:[#allocation2 + $0x22] sm:$0xff] }
  0x88   :  { %200 = vst.msk [vmem:[#allocation3 + $0x40] sm:$0xff] %vm69_vm3, %v204_v15  ;;  %v148_v18 = vld [vmem:[#allocation2 + $0x9] sm:$0xff]  ;;  %v150_v28 = vld [vmem:[#allocation2 + $0x21] sm:$0xff] }
  0x89   :  { %201 = vst.msk [vmem:[#allocation3 + $0x68] sm:$0xff] %vm69_vm3, %v205_v16 }
  0x8a   :  { %202 = vst.msk [vmem:[#allocation3 + $0x90] sm:$0xff] %vm69_vm3, %v2020_v17 }
  0x8d   :  { %131 = vrot.lane.b32.xlu0 %v147_v10, %s1923_s19 }
  0x8e   :  { %157 = vrot.lane.b32.xlu1 %v148_v18, %s1922_s18 }
  0x8f   :  { %179 = vrot.lane.b32.xlu2 %v147_v10, %s1924_s20  ;;  %v303_v10 = vld [vmem:[%s3083_s1 + $0x100] sm:$0xff] }
  0x90   :  { %428 = vmatpush.msra.mxu2 %v303_v10 }
  0x95   :  { %213 = vrot.lane.b32.xlu0 %v204_v15, %s1921_s0 }
  0x96   :  { %235 = vrot.lane.b32.xlu1 %v203_v13, %s1925_s21  ;;  %v293_v13 = vld [vmem:[%s3083_s1 + $0xb0] sm:$0xff] }
  0x97   :  { %107 = vrot.lane.b32.xlu2 %v74_v11, %s1925_s21  ;;  %v294_v11 = vld [vmem:[%s3083_s1 + $0xb8] sm:$0xff] }
  0x98   :  { %392 = vmatpush.msra.mxu1 %v294_v11 }
  0x9a   :  { %393 = vmatpush.msra.mxu1 %v293_v13 }
  0x9d   :  { %133 = vrot.lane.b32.xlu0 %v148_v18, %s1923_s19 }
  0x9e   :  { %159 = vrot.lane.b32.xlu1 %v149_v19, %s1922_s18 }
  0x9f   :  { %181 = vrot.lane.b32.xlu2 %v148_v18, %s1924_s20  ;;  %v319_v18 = vld [vmem:[%s3083_s1 + $0x180] sm:$0xff] }
  0xa5   :  { %215 = vrot.lane.b32.xlu0 %v205_v16, %s1921_s0 }
  0xa6   :  { %237 = vrot.lane.b32.xlu1 %v204_v15, %s1925_s21  ;;  %v292_v15 = vld [vmem:[%s3083_s1 + $0xa8] sm:$0xff] }
  0xa7   :  { %109 = vrot.lane.b32.xlu2 %v75_v14, %s1925_s21  ;;  %v321_v14 = vld [vmem:[%s3083_s1 + $0x190] sm:$0xff]  ;;  %394 = vmatpush.msra.mxu1 %v292_v15 }
  0xad   :  { %135 = vrot.lane.b32.xlu0 %v149_v19, %s1923_s19 }
  0xae   :  { %161 = vrot.lane.b32.xlu1 %v150_v28, %s1922_s18 }
  0xaf   :  { %183 = vrot.lane.b32.xlu2 %v149_v19, %s1924_s20 }
  0xb5   :  { %217 = vrot.lane.b32.xlu0 %v2020_v17, %s1921_s0 }
  0xb6   :  { %239 = vrot.lane.b32.xlu1 %v205_v16, %s1925_s21  ;;  %v320_v16 = vld [vmem:[%s3083_s1 + $0x188] sm:$0xff] }
  0xb7   :  { %111 = vrot.lane.b32.xlu2 %v2002_v9, %s1925_s21 }
  0xbd   :  { %137 = vrot.lane.b32.xlu0 %v150_v28, %s1923_s19 }
  0xbe   :  { %241 = vrot.lane.b32.xlu1 %v2020_v17, %s1925_s21  ;;  %v291_v17 = vld [vmem:[%s3083_s1 + $0xa0] sm:$0xff] }
  0xbf   :  { %185 = vrot.lane.b32.xlu2 %v150_v28, %s1924_s20  ;;  %395 = vmatpush.msra.mxu1 %v291_v17  ;;  %v339_v28 = vld [vmem:[%s3083_s1 + $0x220] sm:$0xff] }
  0xc0   :  { %482 = vmatpush.msrb.mxu0 %v339_v28  ;;  %v530_v28 = vld [vmem:[%s3084_s7 + $0x40] sm:$0xff] }
  0xc1   :  { %396 = vmatpush.msra.mxu1 %v290_v21  ;;  %v534_v21 = vld [vmem:[%s3084_s7 + $0x60] sm:$0xff] }
  0xc2   :  { %483 = vmatpush.msrb.mxu0 %v338_v31 }
  0xc3   :  { %397 = vmatpush.msra.mxu1 %v289_v23 }
  0xc4   :  { %484 = vmatpush.msrb.mxu0 %v337_v32  ;;  %v529_v32 = vld [vmem:[%s3084_s7 + $0x38] sm:$0xff] }
  0xc5   :  { %398 = vmatpush.msra.mxu1 %v288_v25  ;;  %v532_v25 = vld [vmem:[%s3084_s7 + $0x50] sm:$0xff] }
  0xc6   :  { %485 = vmatpush.msrb.mxu0 %v336_v33  ;;  %v528_v33 = vld [vmem:[%s3084_s7 + $0x30] sm:$0xff] }
  0xc7   :  { %113 = vrot.lane.b32.xlu2 %v2011_v12, %s1925_s21  ;;  %v322_v12 = vld [vmem:[%s3083_s1 + $0x198] sm:$0xff]  ;;  %399 = vmatpush.msra.mxu1 %v287_v27 }
  0xc8   :  { %454 = vmatpush.msra.mxu3 %v322_v12  ;;  %486 = vmatpush.msrb.mxu0 %v335_v35  ;;  %v526_v35 = vld [vmem:[%s3084_s7 + $0x20] sm:$0xff] }
  0xca   :  { %455 = vmatpush.msra.mxu3 %v321_v14 }
  0xcc   :  { %456 = vmatpush.msra.mxu3 %v320_v16 }
  0xce   :  { %457 = vmatpush.msra.mxu3 %v319_v18  ;;  %v537_v18 = vld [vmem:[%s3084_s7 + $0x78] sm:$0xff] }
  0xcf   :  { %538 = vmatpush.msrb.mxu1 %v537_v18  ;;  %558 = vmatpush.msrb.mxu2 %v537_v18 }
  0xd9   :  { %v83_v9 = vpop.permute.xlu2 %82 }
  0xda   :  { %95 = vst.msk [vmem:[#allocation3] sm:$0xff] %vm94_vm4, %v83_v9 }
  0xe1   :  { %v85_v19 = vpop.permute.xlu2 %84  ;;  %v251_v20 = vld [vmem:[#allocation3] sm:$0xff] }
  0xe2   :  { %96 = vst.msk [vmem:[#allocation3 + $0x28] sm:$0xff] %vm94_vm4, %v85_v19  ;;  %371 = vmatmul.f32.vlgmr.msra.gmra.mxu0 %v251_v20  ;;  %v536_v19 = vld [vmem:[%s3084_s7 + $0x70] sm:$0xff]  ;;  %v535_v20 = vld [vmem:[%s3084_s7 + $0x68] sm:$0xff] }
  0xe3   :  { %539 = vmatpush.msrb.mxu1 %v536_v19  ;;  %559 = vmatpush.msrb.mxu2 %v536_v19 }
  0xe5   :  { %540 = vmatpush.msrb.mxu1 %v535_v20  ;;  %560 = vmatpush.msrb.mxu2 %v535_v20 }
  0xe7   :  { %541 = vmatpush.msrb.mxu1 %v534_v21  ;;  %561 = vmatpush.msrb.mxu2 %v534_v21 }
  0xe9   :  { %v180_v29 = vpop.permute.xlu2 %179  ;;  %v256_v30 = vld [vmem:[#allocation3 + $0x28] sm:$0xff]  ;;  %542 = vmatpush.msrb.mxu1 %v533_v24  ;;  %562 = vmatpush.msrb.mxu2 %v533_v24 }
  0xea   :  { %374 = vmatmul.f32.gmra.mxu0 %v256_v30 }
  0xeb   :  { %543 = vmatpush.msrb.mxu1 %v532_v25  ;;  %563 = vmatpush.msrb.mxu2 %v532_v25 }
  0xed   :  { %544 = vmatpush.msrb.mxu1 %v531_v26  ;;  %564 = vmatpush.msrb.mxu2 %v531_v26  ;;  %v598_v26 = vld [vmem:[%s3085_s8] sm:$0xff] }
  0xee   :  { %618 = vmatpush.msrb.mxu3 %v598_v26 }
  0xef   :  { %v87_v34 = vpop.permute.xlu0 %86  ;;  %545 = vmatpush.msrb.mxu1 %v530_v28  ;;  %565 = vmatpush.msrb.mxu2 %v530_v28 }
  0xf0   :  { %v156_v36 = vpop.permute.xlu1 %155  ;;  %97 = vst.msk [vmem:[#allocation3 + $0x50] sm:$0xff] %vm94_vm4, %v87_v34  ;;  %v527_v34 = vld [vmem:[%s3084_s7 + $0x28] sm:$0xff] }
  0xf1   :  { %v108_v37 = vpop.permute.xlu2 %107  ;;  %167 = vst.msk [vmem:[#allocation3 + $0x10] sm:$0xff] %vm69_vm3, %v156_v36  ;;  %546 = vmatpush.msrb.mxu1 %v529_v32  ;;  %566 = vmatpush.msrb.mxu2 %v529_v32 }
  0xf2   :  { %191 = vst.msk [vmem:[#allocation3 + $0x10] sm:$0xff] %vm94_vm4, %v180_v29 }
  0xf3   :  { %119 = vst.msk [vmem:[#allocation3 + $0x8] sm:$0xff] %vm69_vm3, %v108_v37  ;;  %547 = vmatpush.msrb.mxu1 %v528_v33  ;;  %567 = vmatpush.msrb.mxu2 %v528_v33  ;;  %v525_v37 = vld [vmem:[%s3084_s7 + $0x18] sm:$0xff] }
  0xf5   :  { %548 = vmatpush.msrb.mxu1 %v527_v34  ;;  %568 = vmatpush.msrb.mxu2 %v527_v34 }
  0xf7   :  { %v89_v38 = vpop.permute.xlu0 %88  ;;  %v261_v39 = vld [vmem:[#allocation3 + $0x50] sm:$0xff]  ;;  %549 = vmatpush.msrb.mxu1 %v526_v35  ;;  %569 = vmatpush.msrb.mxu2 %v526_v35 }
  0xf8   :  { %v212_v40 = vpop.permute.xlu1 %211  ;;  %98 = vst.msk [vmem:[#allocation3 + $0x78] sm:$0xff] %vm94_vm4, %v89_v38  ;;  %377 = vmatmul.f32.gmra.mxu0 %v261_v39 }
  0xf9   :  { %v182_v41 = vpop.permute.xlu2 %181  ;;  %223 = vst.msk [vmem:[#allocation3 + $0x18] sm:$0xff] %vm94_vm4, %v212_v40  ;;  %v253_v42 = vld [vmem:[#allocation3 + $0x10] sm:$0xff]  ;;  %550 = vmatpush.msrb.mxu1 %v525_v37  ;;  %570 = vmatpush.msrb.mxu2 %v525_v37 }
  0xfa   :  { %429 = vmatmul.f32.vlgmr.msra.gmra.mxu2 %v253_v42 }
  0xff   :  { %v132_v43 = vpop.permute.xlu0 %131  ;;  %v266_v44 = vld [vmem:[#allocation3 + $0x78] sm:$0xff] }
 0x100   :  { %v158_v45 = vpop.permute.xlu1 %157  ;;  %143 = vst.msk [vmem:[#allocation3 + $0x8] sm:$0xff] %vm94_vm4, %v132_v43  ;;  %380 = vmatmul.f32.gmra.mxu0 %v266_v44  ;;  %v254_v47 = vld [vmem:[#allocation3 + $0x18] sm:$0xff] }
 0x101   :  { %v110_v46 = vpop.permute.xlu2 %109  ;;  %168 = vst.msk [vmem:[#allocation3 + $0x38] sm:$0xff] %vm69_vm3, %v158_v45  ;;  %458 = vmatmul.f32.vlgmr.msra.gmra.mxu3 %v254_v47  ;;  %v523_v43 = vld [vmem:[%s3084_s7 + $0x8] sm:$0xff] }
 0x102   :  { %192 = vst.msk [vmem:[#allocation3 + $0x38] sm:$0xff] %vm94_vm4, %v182_v41  ;;  %v524_v41 = vld [vmem:[%s3084_s7 + $0x10] sm:$0xff] }
 0x103   :  { %120 = vst.msk [vmem:[#allocation3 + $0x30] sm:$0xff] %vm69_vm3, %v110_v46  ;;  %551 = vmatpush.msrb.mxu1 %v524_v41  ;;  %571 = vmatpush.msrb.mxu2 %v524_v41  ;;  %v522_v46 = vld [vmem:[%s3084_s7] sm:$0xff] }
 0x105   :  { %552 = vmatpush.msrb.mxu1 %v523_v43  ;;  %572 = vmatpush.msrb.mxu2 %v523_v43  ;;  %v595_v43 = vld [vmem:[%s3087_s4] sm:$0x1] }
 0x107   :  { %v214_v48 = vpop.permute.xlu0 %213  ;;  %v252_v49 = vld [vmem:[#allocation3 + $0x8] sm:$0xff]  ;;  %553 = vmatpush.msrb.mxu1 %v522_v46  ;;  %573 = vmatpush.msrb.mxu2 %v522_v46 }
 0x108   :  { %v236_v50 = vpop.permute.xlu1 %235  ;;  %224 = vst.msk [vmem:[#allocation3 + $0x40] sm:$0xff] %vm94_vm4, %v214_v48  ;;  %400 = vmatmul.f32.vlgmr.msra.gmra.mxu1 %v252_v49  ;;  %v1219_v46 = vld [vmem:[%s3088_s2 + $0x78] sm:$0xff] }
 0x109   :  { %v184_v51 = vpop.permute.xlu2 %183  ;;  %247 = vst.msk [vmem:[#allocation3 + $0x20] sm:$0xff] %vm69_vm3, %v236_v50  ;;  %v258_v52 = vld [vmem:[#allocation3 + $0x38] sm:$0xff]  ;;  %641 = vmatpush.msra.mxu1 %v598_v26  ;;  %1348 = vmatpush.msra.mxu0 %v1219_v46  ;;  %v1262_v26 = vld [vmem:[%s3088_s2 + $0x1d0] sm:$0xff] }
 0x10a   :  { %432 = vmatmul.f32.gmra.mxu2 %v258_v52 }
 0x10f   :  { %v134_v53 = vpop.permute.xlu0 %133  ;;  %v259_v54 = vld [vmem:[#allocation3 + $0x40] sm:$0xff] }
 0x110   :  { %v160_v55 = vpop.permute.xlu1 %159  ;;  %144 = vst.msk [vmem:[#allocation3 + $0x30] sm:$0xff] %vm94_vm4, %v134_v53  ;;  %461 = vmatmul.f32.gmra.mxu3 %v259_v54  ;;  %v255_v57 = vld [vmem:[#allocation3 + $0x20] sm:$0xff] }
 0x111   :  { %v112_v56 = vpop.permute.xlu2 %111  ;;  %169 = vst.msk [vmem:[#allocation3 + $0x60] sm:$0xff] %vm69_vm3, %v160_v55  ;;  %1776 = vmatmul.msk.f32.vlgmr.msrb.gmra.mxu0 %vm69_vm3, %v255_v57 }
 0x112   :  { %193 = vst.msk [vmem:[#allocation3 + $0x60] sm:$0xff] %vm94_vm4, %v184_v51 }
 0x113   :  { %121 = vst.msk [vmem:[#allocation3 + $0x58] sm:$0xff] %vm69_vm3, %v112_v56 }
 0x117   :  { %v216_v58 = vpop.permute.xlu0 %215  ;;  %v257_v59 = vld [vmem:[#allocation3 + $0x30] sm:$0xff] }
 0x118   :  { %v238_v60 = vpop.permute.xlu1 %237  ;;  %225 = vst.msk [vmem:[#allocation3 + $0x68] sm:$0xff] %vm94_vm4, %v216_v58  ;;  %403 = vmatmul.f32.gmra.mxu1 %v257_v59 }
 0x119   :  { %v186_v61 = vpop.permute.xlu2 %185  ;;  %248 = vst.msk [vmem:[#allocation3 + $0x48] sm:$0xff] %vm69_vm3, %v238_v60  ;;  %v263_v62 = vld [vmem:[#allocation3 + $0x60] sm:$0xff] }
 0x11a   :  { %435 = vmatmul.f32.gmra.mxu2 %v263_v62 }
 0x11f   :  { %v136_v63 = vpop.permute.xlu0 %135  ;;  %v264_v0 = vld [vmem:[#allocation3 + $0x68] sm:$0xff] }
 0x120   :  { %v162_v1 = vpop.permute.xlu1 %161  ;;  %145 = vst.msk [vmem:[#allocation3 + $0x58] sm:$0xff] %vm94_vm4, %v136_v63  ;;  %464 = vmatmul.f32.gmra.mxu3 %v264_v0  ;;  %v260_v4 = vld [vmem:[#allocation3 + $0x48] sm:$0xff] }
 0x121   :  { %v114_v3 = vpop.permute.xlu2 %113  ;;  %170 = vst.msk [vmem:[#allocation3 + $0x88] sm:$0xff] %vm69_vm3, %v162_v1  ;;  %1777 = vmatmul.msk.f32.gmra.mxu0 %vm69_vm3, %v260_v4 }
 0x122   :  { %194 = vst.msk [vmem:[#allocation3 + $0x88] sm:$0xff] %vm94_vm4, %v186_v61 }
 0x123   :  { %122 = vst.msk [vmem:[#allocation3 + $0x80] sm:$0xff] %vm69_vm3, %v114_v3 }
 0x127   :  { %v218_v5 = vpop.permute.xlu0 %217  ;;  %v262_v6 = vld [vmem:[#allocation3 + $0x58] sm:$0xff] }
 0x128   :  { %v240_v7 = vpop.permute.xlu1 %239  ;;  %226 = vst.msk [vmem:[#allocation3 + $0x90] sm:$0xff] %vm94_vm4, %v218_v5  ;;  %406 = vmatmul.f32.gmra.mxu1 %v262_v6 }
 0x129   :  { %249 = vst.msk [vmem:[#allocation3 + $0x70] sm:$0xff] %vm69_vm3, %v240_v7  ;;  %v268_v8 = vld [vmem:[#allocation3 + $0x88] sm:$0xff] }
 0x12a   :  { %438 = vmatmul.f32.gmra.mxu2 %v268_v8 }
 0x12f   :  { %v138_v9 = vpop.permute.xlu0 %137  ;;  %v269_v10 = vld [vmem:[#allocation3 + $0x90] sm:$0xff] }
 0x130   :  { %v242_v11 = vpop.permute.xlu1 %241  ;;  %146 = vst.msk [vmem:[#allocation3 + $0x80] sm:$0xff] %vm94_vm4, %v138_v9  ;;  %467 = vmatmul.f32.gmra.mxu3 %v269_v10  ;;  %v265_v12 = vld [vmem:[#allocation3 + $0x70] sm:$0xff]  ;;  %vm805_vm4 = vcmask 916480  }
 0x131   :  { %250 = vst.msk [vmem:[#allocation3 + $0x98] sm:$0xff] %vm69_vm3, %v242_v11  ;;  %1778 = vmatmul.msk.f32.gmra.mxu0 %vm69_vm3, %v265_v12 }
 0x137   :  { %v267_v13 = vld [vmem:[#allocation3 + $0x80] sm:$0xff] }
 0x138   :  { %409 = vmatmul.f32.gmra.mxu1 %v267_v13  ;;  %v270_v14 = vld [vmem:[#allocation3 + $0x98] sm:$0xff] }
 0x139   :  { %1779 = vmatmul.msk.f32.gmra.mxu0 %vm69_vm3, %v270_v14  ;;  %vm760_vm3 = vcmask 982016  }
 0x15f   :  { %v372_v15 = vpop.f32.mrf.mxu0 }
 0x167   :  { %v375_v16 = vpop.f32.mrf.mxu0 }
 0x175   :  { %v378_v17 = vpop.f32.mrf.mxu0 }
 0x17d   :  { %v381_v22 = vpop.f32.mrf.mxu0  ;;  %v430_v27 = vpop.f32.mrf.mxu2 }
 0x184   :  { %v459_v29 = vpop.f32.mrf.mxu3 }
 0x185   :  { %v401_v23 = vpop.f32.mrf.mxu1 }
 0x186   :  { %v402_v44 = vadd.f32 %v401_v23, %v372_v15 }
 0x188   :  { %v431_v49 = vadd.f32 %v430_v27, %v402_v44 }
 0x18a   :  { %v460_v54 = vadd.f32 %v459_v29, %v431_v49  ;;  %v1216_v49 = vld [vmem:[%s3088_s2 + $0x60] sm:$0xff] }
 0x18d   :  { %v433_v36 = vpop.f32.mrf.mxu2 }
 0x18e   :  { %v488_v30 = vpop.f32.mrf.mxu0 }
 0x18f   :  { %v2351_v58 = vadd.f32 %v488_v30, %v460_v54 }
 0x191   :  { %v509_v1 = vmul.f32 %v2351_v58, %v2351_v58 }
 0x193   :  { %v462_v38 = vpop.f32.mrf.mxu3 }
 0x195   :  { %v404_v31 = vpop.f32.mrf.mxu1 }
 0x196   :  { %v405_v42 = vadd.f32 %v404_v31, %v375_v16 }
 0x198   :  { %v434_v47 = vadd.f32 %v433_v36, %v405_v42 }
 0x19a   :  { %v463_v53 = vadd.f32 %v462_v38, %v434_v47  ;;  %v1218_v47 = vld [vmem:[%s3088_s2 + $0x70] sm:$0xff] }
 0x19b   :  { %1349 = vmatpush.msra.mxu0 %v1218_v47 }
 0x19d   :  { %v436_v48 = vpop.f32.mrf.mxu2 }
 0x19e   :  { %v491_v39 = vpop.f32.mrf.mxu0 }
 0x19f   :  { %v2349_v55 = vadd.f32 %v491_v39, %v463_v53 }
 0x1a1   :  { %v510_v62 = vmul.f32 %v2349_v55, %v2349_v55  ;;  %v500_v3 = vadd.f32 %v2349_v55, %v2351_v58 }
 0x1a3   :  { %v465_v51 = vpop.f32.mrf.mxu3  ;;  %v513_v7 = vadd.f32 %v510_v62, %v509_v1  ;;  %v1210_v1 = vld [vmem:[%s3088_s2 + $0x30] sm:$0xff] }
 0x1a5   :  { %v407_v40 = vpop.f32.mrf.mxu1 }
 0x1a6   :  { %v408_v45 = vadd.f32 %v407_v40, %v378_v17  ;;  %v582_v40 = vld [vmem:[%s3086_s3] sm:$0x1] }
 0x1a8   :  { %v437_v50 = vadd.f32 %v436_v48, %v408_v45  ;;  %v1217_v48 = vld [vmem:[%s3088_s2 + $0x68] sm:$0xff] }
 0x1a9   :  { %1350 = vmatpush.msra.mxu0 %v1217_v48 }
 0x1aa   :  { %v466_v56 = vadd.f32 %v465_v51, %v437_v50  ;;  %v1215_v50 = vld [vmem:[%s3088_s2 + $0x58] sm:$0xff]  ;;  %v1214_v51 = vld [vmem:[%s3088_s2 + $0x50] sm:$0xff] }
 0x1ab   :  { %1351 = vmatpush.msra.mxu0 %v1216_v49 }
 0x1ad   :  { %v439_v61 = vpop.f32.mrf.mxu2  ;;  %1352 = vmatpush.msra.mxu0 %v1215_v50 }
 0x1ae   :  { %v494_v52 = vpop.f32.mrf.mxu0 }
 0x1af   :  { %v2353_v59 = vadd.f32 %v494_v52, %v466_v56  ;;  %v1213_v52 = vld [vmem:[%s3088_s2 + $0x48] sm:$0xff]  ;;  %1353 = vmatpush.msra.mxu0 %v1214_v51 }
 0x1b1   :  { %v511_v4 = vmul.f32 %v2353_v59, %v2353_v59  ;;  %v501_v8 = vadd.f32 %v500_v3, %v2353_v59  ;;  %1354 = vmatpush.msra.mxu0 %v1213_v52 }
 0x1b3   :  { %v468_v0 = vpop.f32.mrf.mxu3  ;;  %v514_v10 = vadd.f32 %v513_v7, %v511_v4  ;;  %1355 = vmatpush.msra.mxu0 %v1212_v2 }
 0x1b5   :  { %v410_v57 = vpop.f32.mrf.mxu1 }
 0x1b6   :  { %v411_v60 = vadd.f32 %v410_v57, %v381_v22  ;;  %v497_v6 = vpop.f32.mrf.mxu0 }
 0x1b8   :  { %v440_v63 = vadd.f32 %v439_v61, %v411_v60  ;;  %v1211_v60 = vld [vmem:[%s3088_s2 + $0x38] sm:$0xff] }
 0x1b9   :  { %1356 = vmatpush.msra.mxu0 %v1211_v60 }
 0x1ba   :  { %v469_v5 = vadd.f32 %v468_v0, %v440_v63 }
 0x1bb   :  { %1357 = vmatpush.msra.mxu0 %v1210_v1 }
 0x1bc   :  { %v2364_v9 = vadd.f32 %v497_v6, %v469_v5  ;;  %v1209_v6 = vld [vmem:[%s3088_s2 + $0x28] sm:$0xff] }
 0x1bd   :  { %1358 = vmatpush.msra.mxu0 %v1209_v6  ;;  %v1234_v6 = vld [vmem:[%s3088_s2 + $0xf0] sm:$0xff] }
 0x1be   :  { %v502_v11 = vadd.f32 %v501_v8, %v2364_v9  ;;  %v512_v12 = vmul.f32 %v2364_v9, %v2364_v9 }
 0x1c0   :  { %v503_v13 = vrot.slane %v502_v11, 4  ;;  %v515_v14 = vadd.f32 %v514_v10, %v512_v12 }
 0x1c2   :  { %v504_v15 = vadd.f32 %v503_v13, %v502_v11  ;;  %v516_v16 = vrot.slane %v515_v14, 4  ;;  %v1208_v11 = vld [vmem:[%s3088_s2 + $0x20] sm:$0xff] }
 0x1c3   :  { %1359 = vmatpush.msra.mxu0 %v1208_v11 }
 0x1c4   :  { %v505_v17 = vrot.slane %v504_v15, 2  ;;  %v517_v18 = vadd.f32 %v516_v16, %v515_v14  ;;  %v1207_v16 = vld [vmem:[%s3088_s2 + $0x18] sm:$0xff] }
 0x1c5   :  { %1360 = vmatpush.msra.mxu0 %v1207_v16 }
 0x1c6   :  { %v506_v19 = vadd.f32 %v505_v17, %v504_v15  ;;  %v518_v20 = vrot.slane %v517_v18, 2  ;;  %v1206_v17 = vld [vmem:[%s3088_s2 + $0x10] sm:$0xff] }
 0x1c7   :  { %1361 = vmatpush.msra.mxu0 %v1206_v17 }
 0x1c8   :  { %v507_v21 = vrot.slane %v506_v19, 1  ;;  %v519_v22 = vadd.f32 %v518_v20, %v517_v18  ;;  %v1267_v18 = vld [vmem:[%s3088_s2 + $0x1f8] sm:$0xff]  ;;  %v1917_v20 = vld [vmem:[#allocation4] sm:$0xff] }
 0x1c9   :  { %667 = vst.msk [vmem:[#allocation4 + $0x28] sm:$0x3] %vm666_vm11, %v1917_v20 }
 0x1ca   :  { %v508_v23 = vadd.f32 %v507_v21, %v506_v19  ;;  %v520_v24 = vrot.slane %v519_v22, 1  ;;  %v1266_v19 = vld [vmem:[%s3088_s2 + $0x1f0] sm:$0xff]  ;;  %v1205_v21 = vld [vmem:[%s3088_s2 + $0x8] sm:$0xff]  ;;  %673 = vst.msk [vmem:[#allocation4 + $0x58] sm:$0x3] %vm666_vm11, %v1917_v20 }
 0x1cb   :  { %1362 = vmatpush.msra.mxu0 %v1205_v21 }
 0x1cc   :  { %554 = vmatmul.f32.vlgmr.msrb.gmra.mxu1 %v508_v23  ;;  %v521_v25 = vadd.f32 %v520_v24, %v519_v22  ;;  %v1204_v22 = vld [vmem:[%s3088_s2] sm:$0xff]  ;;  %v1265_v23 = vld [vmem:[%s3088_s2 + $0x1e8] sm:$0xff] }
 0x1cd   :  { %1435 = vmatpush.msrb.mxu1 %v1267_v18  ;;  %1363 = vmatpush.msra.mxu0 %v1204_v22  ;;  %v1264_v24 = vld [vmem:[%s3088_s2 + $0x1e0] sm:$0xff] }
 0x1ce   :  { %574 = vmatmul.f32.vlgmr.msrb.gmra.mxu2 %v521_v25  ;;  %v1263_v25 = vld [vmem:[%s3088_s2 + $0x1d8] sm:$0xff] }
 0x1cf   :  { %1436 = vmatpush.msrb.mxu1 %v1266_v19 }
 0x1d1   :  { %1437 = vmatpush.msrb.mxu1 %v1265_v23 }
 0x1d3   :  { %1438 = vmatpush.msrb.mxu1 %v1264_v24 }
 0x1d5   :  { %1439 = vmatpush.msrb.mxu1 %v1263_v25 }
 0x1d7   :  { %1440 = vmatpush.msrb.mxu1 %v1262_v26  ;;  %v1232_v26 = vld [vmem:[%s3088_s2 + $0xe0] sm:$0xff] }
 0x249   :  { %v555_v27 = vpop.f32.mrf.mxu1 }
 0x24a   :  { %v578_v28 = vmul.f32 0.001953125, %v555_v27  ;;  %v1261_v27 = vld [vmem:[%s3088_s2 + $0x1c8] sm:$0xff] }
 0x24b   :  { %1441 = vmatpush.msrb.mxu1 %v1261_v27  ;;  %v1231_v27 = vld [vmem:[%s3088_s2 + $0xd8] sm:$0xff] }
 0x24c   :  { %v580_v30 = vmul.f32 %v578_v28, %v578_v28 }
 0x251   :  { %v575_v29 = vpop.f32.mrf.mxu2 }
 0x252   :  { %v579_v31 = vmul.f32 0.001953125, %v575_v29  ;;  %v1259_v29 = vld [vmem:[%s3088_s2 + $0x1b8] sm:$0xff] }
 0x254   :  { %v581_v32 = vsub.f32 %v579_v31, %v580_v30  ;;  %v1258_v30 = vld [vmem:[%s3088_s2 + $0x1b0] sm:$0xff]  ;;  %v1257_v31 = vld [vmem:[%s3088_s2 + $0x1a8] sm:$0xff] }
 0x256   :  { %v583_v33 = vadd.f32 1e-05, %v581_v32  ;;  %v1256_v32 = vld [vmem:[%s3088_s2 + $0x1a0] sm:$0xff] }
 0x258   :  { %1913 = vrsqrt.f32 %v583_v33  ;;  %vm590_vm6 = vweird.f32 %v583_v33 }
 0x25e   :  { %v1914_v34 = vpop.eup %1913 }
 0x25f   :  { %v585_v35 = vmul.f32 %v1914_v34, %v583_v33  ;;  %vm591_vm5 = vweird.f32 %v1914_v34  ;;  %v1255_v33 = vld [vmem:[%s3088_s2 + $0x198] sm:$0xff] }
 0x260   :  { %vm592_vm7 = vmor %vm590_vm6, %vm591_vm5 }
 0x261   :  { %v586_v36 = vmul.f32 %v1914_v34, %v585_v35  ;;  %v1254_v35 = vld [vmem:[%s3088_s2 + $0x190] sm:$0xff] }
 0x263   :  { %v587_v37 = vmul.f32 0.5, %v586_v36  ;;  %v1253_v36 = vld [vmem:[%s3088_s2 + $0x188] sm:$0xff] }
 0x265   :  { %v588_v38 = vsub.f32 1.5, %v587_v37  ;;  %v1252_v37 = vld [vmem:[%s3088_s2 + $0x180] sm:$0xff] }
 0x267   :  { %v589_v39 = vmul.f32 %v1914_v34, %v588_v38 }
 0x269   :  { %v593_v41 = vsel %vm592_vm7, %v1914_v34, %v589_v39 }
 0x26a   :  { %v594_v42 = vmul.f32 %v593_v41, %v582_v40 }
 0x26c   :  { %v596_v44 = vmul.f32 %v594_v42, %v578_v28  ;;  %1780 = vmatmul.msk.f32.vlgmr.msrb.gmra.mxu3 %vm599_vm8, %v594_v42  ;;  %v1260_v28 = vld [vmem:[%s3088_s2 + $0x1c0] sm:$0xff] }
 0x26d   :  { %1442 = vmatpush.msrb.mxu1 %v1260_v28 }
 0x26e   :  { %v597_v45 = vsub.f32 %v595_v43, %v596_v44 }
 0x26f   :  { %1443 = vmatpush.msrb.mxu1 %v1259_v29 }
 0x270   :  { %1781 = vmatmul.msk.f32.vlgmr.msra.gmra.mxu1 %vm599_vm8, %v597_v45 }
 0x271   :  { %1444 = vmatpush.msrb.mxu1 %v1258_v30 }
 0x273   :  { %1445 = vmatpush.msrb.mxu1 %v1257_v31 }
 0x275   :  { %1446 = vmatpush.msrb.mxu1 %v1256_v32 }
 0x277   :  { %1447 = vmatpush.msrb.mxu1 %v1255_v33 }
 0x279   :  { %1448 = vmatpush.msrb.mxu1 %v1254_v35 }
 0x27b   :  { %1449 = vmatpush.msrb.mxu1 %v1253_v36 }
 0x27d   :  { %1450 = vmatpush.msrb.mxu1 %v1252_v37 }
 0x2ed   :  { %v643_v53 = vpop.f32.mrf.mxu1 }
 0x2ee   :  { %v651_v57 = vperm.slane %v643_v53, 0 }
 0x2ef   :  { %v620_v54 = vpop.f32.mrf.mxu3 }
 0x2f0   :  { %v646_v56 = vperm.slane %v620_v54, 0 }
 0x2f2   :  { %v648_v61 = vmul.f32 %v646_v56, %v2349_v55  ;;  %v649_v62 = vmul.f32 %v646_v56, %v2353_v59  ;;  %v647_v63 = vmul.f32 %v646_v56, %v2351_v58  ;;  %v650_v0 = vmul.f32 %v646_v56, %v2364_v9 }
 0x2f4   :  { %v654_v3 = vadd.f32 %v651_v57, %v649_v62  ;;  %v652_v4 = vadd.f32 %v651_v57, %v647_v63  ;;  %v653_v5 = vadd.f32 %v651_v57, %v648_v61  ;;  %v655_v8 = vadd.f32 %v651_v57, %v650_v0 }
 0x2f6   :  { %v658_v55 = vmax.f32 %v654_v3, 0.0  ;;  %v656_v7 = vmax.f32 %v652_v4, 0.0  ;;  %v657_v59 = vmax.f32 %v653_v5, 0.0  ;;  %v659_v13 = vmax.f32 %v655_v8, 0.0  ;;  %v1235_v5 = vld [vmem:[%s3088_s2 + $0xf8] sm:$0xff] }
 0x2f7   :  { %1377 = vmatpush.msra.mxu2 %v1235_v5 }
 0x2f8   :  { %v682_v58 = vrot.slane %v658_v55, 7  ;;  %v679_v9 = vrot.slane %v656_v7, 7  ;;  %v680_v10 = vrot.slane %v657_v59, 7  ;;  %v683_v14 = vrot.slane %v659_v13, 7 }
 0x2f9   :  { %1378 = vmatpush.msra.mxu2 %v1234_v6 }
 0x2fa   :  { %691 = vrot.lane.b32.xlu1 %v682_v58, %s1926_s15  ;;  %685 = vrot.lane.b32.xlu2 %v679_v9, %s1926_s15  ;;  %v681_v12 = vsel %vm678_vm10, %v679_v9, %v680_v10  ;;  %v684_v15 = vsel %vm678_vm10, %v682_v58, %v683_v14 }
 0x2fb   :  { %687 = vrot.lane.b32.xlu0 %v681_v12, %s1926_s15 }
 0x302   :  { %695 = vrot.lane.b32.xlu1 %v683_v14, %s1926_s15  ;;  %689 = vrot.lane.b32.xlu2 %v680_v10, %s1926_s15 }
 0x303   :  { %693 = vrot.lane.b32.xlu0 %v684_v15, %s1926_s15  ;;  %v1233_v15 = vld [vmem:[%s3088_s2 + $0xe8] sm:$0xff] }
 0x304   :  { %1379 = vmatpush.msra.mxu2 %v1233_v15  ;;  %v1226_v15 = vld [vmem:[%s3088_s2 + $0xb0] sm:$0xff] }
 0x306   :  { %1380 = vmatpush.msra.mxu2 %v1232_v26 }
 0x308   :  { %1381 = vmatpush.msra.mxu2 %v1231_v27  ;;  %v1224_v27 = vld [vmem:[%s3088_s2 + $0xa0] sm:$0xff] }
 0x354   :  { %v686_v34 = vpop.permute.xlu2 %685 }
 0x355   :  { %704 = vst.msk [vmem:[#allocation4] sm:$0xfe] %vm703_vm12, %v686_v34 }
 0x356   :  { %706 = vst.msk [vmem:[#allocation4 + $0x8] sm:$0xfe] %vm705_vm13, %v686_v34 }
 0x35c   :  { %v690_v38 = vpop.permute.xlu2 %689  ;;  %v720_v39 = vld [vmem:[#allocation4] sm:$0xff] }
 0x35d   :  { %711 = vst.msk [vmem:[#allocation4 + $0x20] sm:$0x1] %vm710_vm14, %v690_v38  ;;  %1364 = vmatmul.f32.vlgmr.msra.gmra.mxu0 %v720_v39  ;;  %v729_v40 = vld [vmem:[#allocation4 + $0x8] sm:$0xff]  ;;  %v818_v45 = vld [vmem:[#allocation4] sm:$0xfe] }
 0x35e   :  { %713 = vst.msk [vmem:[#allocation4 + $0x28] sm:$0x1] %vm712_vm15, %v690_v38  ;;  %v1793_v41 = vpack.i.bf16 %v729_v40, %v720_v39  ;;  %v849_v46 = vld [vmem:[#allocation4] sm:$0xfe]  ;;  %v850_v48 = vld [vmem:[#allocation4 + $0x8] sm:$0xfe] }
 0x35f   :  { %v831_v51 = vrot.slane %v818_v45, 1  ;;  %v873_v53 = vrot.slane %v849_v46, 1  ;;  %v876_v2 = vrot.slane %v850_v48, 1  ;;  %v993_v10 = vld [vmem:[#allocation4] sm:$0xfc] }
 0x360   :  { %1794 = vrot.lane.b32.xlu2 %v1793_v41, %s1925_s21  ;;  %1799 = vrot.lane.b32.xlu0 %v1793_v41, %s1927_s30  ;;  %v1006_v19 = vrot.slane %v993_v10, 2  ;;  %v921_v23 = vld [vmem:[#allocation4] sm:$0xfe]  ;;  %v922_v25 = vld [vmem:[#allocation4 + $0x8] sm:$0xfe] }
 0x361   :  { %v1230_v40 = vld [vmem:[%s3088_s2 + $0xd0] sm:$0xff]  ;;  %v948_v45 = vrot.slane %v922_v25, 1  ;;  %v1251_v25 = vld [vmem:[%s3088_s2 + $0x178] sm:$0xff] }
 0x362   :  { %1382 = vmatpush.msra.mxu2 %v1230_v40  ;;  %1406 = vmatpush.msra.mxu3 %v1251_v25 }
 0x364   :  { %v853_v63 = vld [vmem:[#allocation4 + $0x20] sm:$0x1] }
 0x365   :  { %v854_v0 = vld [vmem:[#allocation4 + $0x28] sm:$0x1]  ;;  %v820_v3 = vld [vmem:[#allocation4 + $0x20] sm:$0x1]  ;;  %v879_v55 = vrot.slane %v853_v63, 1 }
 0x366   :  { %v881_v7 = vrot.slane %v854_v0, 1  ;;  %v834_v8 = vrot.slane %v820_v3, 1  ;;  %v995_v24 = vld [vmem:[#allocation4 + $0x20] sm:$0x3]  ;;  %v1228_v3 = vld [vmem:[%s3088_s2 + $0xc0] sm:$0xff] }
 0x367   :  { %v1009_v34 = vrot.slane %v995_v24, 2 }
 0x36c   :  { %v692_v42 = vpop.permute.xlu1 %691 }
 0x36d   :  { %714 = vst.msk [vmem:[#allocation4 + $0x30] sm:$0xfe] %vm703_vm12, %v692_v42  ;;  %v688_v43 = vpop.permute.xlu0 %687 }
 0x36e   :  { %715 = vst.msk [vmem:[#allocation4 + $0x38] sm:$0xfe] %vm705_vm13, %v692_v42 }
 0x36f   :  { %708 = vst.msk [vmem:[#allocation4 + $0x10] sm:$0xff] %vm707_vm0, %v688_v43 }
 0x370   :  { %709 = vst.msk [vmem:[#allocation4 + $0x18] sm:$0xff] %vm599_vm8, %v688_v43 }
 0x374   :  { %v696_v44 = vpop.permute.xlu1 %695  ;;  %v722_v1 = vld [vmem:[#allocation4 + $0x30] sm:$0xff] }
 0x375   :  { %718 = vst.msk [vmem:[#allocation4 + $0x50] sm:$0x1] %vm710_vm14, %v696_v44  ;;  %v694_v47 = vpop.permute.xlu0 %693  ;;  %v778_v4 = vld [vmem:[#allocation4 + $0x38] sm:$0xff]  ;;  %v855_v17 = vld [vmem:[#allocation4 + $0x30] sm:$0xfe] }
 0x376   :  { %719 = vst.msk [vmem:[#allocation4 + $0x58] sm:$0x1] %vm712_vm15, %v696_v44  ;;  %v721_v49 = vld [vmem:[#allocation4 + $0x10] sm:$0xff]  ;;  %v1818_v59 = vpack.i.bf16 %v778_v4, %v722_v1  ;;  %v856_v18 = vld [vmem:[#allocation4 + $0x38] sm:$0xfe]  ;;  %v883_v29 = vrot.slane %v855_v17, 1 }
 0x377   :  { %716 = vst.msk [vmem:[#allocation4 + $0x40] sm:$0xff] %vm707_vm0, %v694_v47  ;;  %1367 = vmatmul.f32.gmra.mxu0 %v721_v49  ;;  %v2497_v50 = vld [vmem:[#allocation4 + $0x18] sm:$0xff]  ;;  %v2499_v52 = vrot.slane %v721_v49, 1  ;;  %v2527_v13 = vrot.slane %v721_v49, 2  ;;  %v821_v20 = vld [vmem:[#allocation4 + $0x30] sm:$0xfe] }
 0x378   :  { %717 = vst.msk [vmem:[#allocation4 + $0x48] sm:$0xff] %vm599_vm8, %v694_v47  ;;  %v1813_v54 = vpack.i.bf16 %v2497_v50, %v721_v49  ;;  %v2504_v56 = vrot.slane %v2497_v50, 1  ;;  %v886_v30 = vrot.slane %v856_v18, 1  ;;  %v836_v33 = vrot.slane %v821_v20, 1  ;;  %v996_v35 = vld [vmem:[#allocation4 + $0x30] sm:$0xfc] }
 0x379   :  { %v833_v57 = vsel %vm830_vm1, %v831_v51, %v2499_v52  ;;  %v875_v60 = vsel %vm830_vm1, %v873_v53, %v2499_v52  ;;  %v880_v58 = vsel %vm830_vm1, %v2499_v52, %v879_v55  ;;  %v835_v14 = vsel %vm830_vm1, %v2499_v52, %v834_v8  ;;  %v1229_v47 = vld [vmem:[%s3088_s2 + $0xc8] sm:$0xff]  ;;  %v1227_v55 = vld [vmem:[%s3088_s2 + $0xb8] sm:$0xff]  ;;  %v1024_v8 = vld [vmem:[#allocation4] sm:$0xfc] }
 0x37a   :  { %1814 = vrot.lane.b32.xlu2 %v1813_v54, %s1927_s30  ;;  %1804 = vrot.lane.b32.xlu1 %v1813_v54, %s1925_s21  ;;  %v878_v61 = vsel %vm830_vm1, %v876_v2, %v2504_v56  ;;  %v882_v9 = vsel %vm830_vm1, %v2504_v56, %v881_v7  ;;  %v2550_v28 = vsel %vm1005_vm2, %v1006_v19, %v2527_v13  ;;  %v945_v44 = vrot.slane %v921_v23, 1  ;;  %v925_v2 = vld [vmem:[#allocation4 + $0x20] sm:$0x1]  ;;  %v1096_v7 = vld [vmem:[#allocation4] sm:$0xfc] }
 0x37b   :  { %1451 = vmatmul.f32.vlgmr.msrb.gmra.mxu1 %v833_v57  ;;  %v1833_v62 = vpack.i.bf16 %v878_v61, %v875_v60  ;;  %v1838_v16 = vpack.i.bf16 %v882_v9, %v880_v58  ;;  %v2571_v48 = vsel %vm1005_vm2, %v2527_v13, %v1009_v34  ;;  %v1011_v49 = vrot.slane %v996_v35, 2  ;;  %v926_v57 = vld [vmem:[#allocation4 + $0x28] sm:$0x1]  ;;  %1383 = vmatpush.msra.mxu2 %v1229_v47  ;;  %v927_v24 = vld [vmem:[#allocation4 + $0x30] sm:$0xfe] }
 0x37c   :  { %v859_v31 = vld [vmem:[#allocation4 + $0x50] sm:$0x1]  ;;  %v947_v60 = vsel %vm830_vm1, %v945_v44, %v2499_v52  ;;  %v951_v5 = vrot.slane %v925_v2, 1  ;;  %v953_v6 = vrot.slane %v926_v57, 1  ;;  %v1120_v18 = vrot.slane %v1096_v7, 2  ;;  %v1223_v35 = vld [vmem:[%s3088_s2 + $0x98] sm:$0xff] }
 0x37d   :  { %1834 = vrot.lane.b32.xlu0 %v1833_v62, %s1925_s21  ;;  %v860_v32 = vld [vmem:[#allocation4 + $0x58] sm:$0x1]  ;;  %v998_v36 = vld [vmem:[#allocation4 + $0x50] sm:$0x3]  ;;  %v889_v42 = vrot.slane %v859_v31, 1  ;;  %1384 = vmatpush.msra.mxu2 %v1228_v3  ;;  %v1048_v19 = vrot.slane %v1024_v8, 2 }
 0x37e   :  { %v723_v11 = vld [vmem:[#allocation4 + $0x40] sm:$0xff]  ;;  %v891_v43 = vrot.slane %v860_v32, 1  ;;  %v1014_v51 = vrot.slane %v998_v36, 2  ;;  %v823_v54 = vld [vmem:[#allocation4 + $0x50] sm:$0x1]  ;;  %v952_v10 = vsel %vm830_vm1, %v2499_v52, %v951_v5  ;;  %v1122_v26 = vsel %vm1005_vm2, %v1120_v18, %v2527_v13  ;;  %v1221_v57 = vld [vmem:[%s3088_s2 + $0x88] sm:$0xff] }
 0x37f   :  { %1370 = vmatmul.f32.gmra.mxu0 %v722_v1  ;;  %v2525_v12 = vld [vmem:[#allocation4 + $0x48] sm:$0xff]  ;;  %v2536_v21 = vrot.slane %v723_v11, 1  ;;  %v2560_v41 = vrot.slane %v723_v11, 2  ;;  %v950_v1 = vsel %vm830_vm1, %v948_v45, %v2504_v56  ;;  %v839_v4 = vrot.slane %v823_v54, 1  ;;  %1385 = vmatpush.msra.mxu2 %v1227_v55  ;;  %v1100_v36 = vld [vmem:[#allocation4 + $0x20] sm:$0x3] }
 0x380   :  { %v2539_v22 = vrot.slane %v2525_v12, 1  ;;  %v1828_v37 = vpack.i.bf16 %v2525_v12, %v723_v11  ;;  %v1848_v9 = vpack.i.bf16 %v950_v1, %v947_v60  ;;  %v1050_v31 = vsel %vm1005_vm2, %v1048_v19, %v2527_v13  ;;  %v1029_v44 = vld [vmem:[#allocation4 + $0x28] sm:$0x3]  ;;  %v1222_v45 = vld [vmem:[%s3088_s2 + $0x90] sm:$0xff]  ;;  %v932_v47 = vld [vmem:[#allocation4 + $0x58] sm:$0x1] }
 0x381   :  { %v885_v38 = vsel %vm830_vm1, %v883_v29, %v2536_v21  ;;  %v838_v46 = vsel %vm830_vm1, %v836_v33, %v2536_v21  ;;  %v2577_v61 = vsel %vm1005_vm2, %v1011_v49, %v2560_v41  ;;  %v2581_v62 = vsel %vm1005_vm2, %v2560_v41, %v1014_v51  ;;  %1386 = vmatpush.msra.mxu2 %v1226_v15  ;;  %v1250_v29 = vld [vmem:[%s3088_s2 + $0x170] sm:$0xff]  ;;  %v1249_v60 = vld [vmem:[%s3088_s2 + $0x168] sm:$0xff]  ;;  %v1220_v3 = vld [vmem:[%s3088_s2 + $0x80] sm:$0xff] }
 0x382   :  { %1819 = vrot.lane.b32.xlu2 %v1818_v59, %s1927_s30  ;;  %1809 = vrot.lane.b32.xlu1 %v1818_v59, %s1925_s21  ;;  %v888_v39 = vsel %vm830_vm1, %v886_v30, %v2539_v22  ;;  %v890_v63 = vsel %vm830_vm1, %v2536_v21, %v889_v42  ;;  %v892_v0 = vsel %vm830_vm1, %v2539_v22, %v891_v43  ;;  %v1097_v59 = vld [vmem:[#allocation4 + $0x8] sm:$0xfc]  ;;  %v955_v33 = vrot.slane %v927_v24, 1  ;;  %v1028_v43 = vld [vmem:[#allocation4 + $0x20] sm:$0x3] }
 0x383   :  { %1454 = vmatmul.f32.gmra.mxu1 %v835_v14  ;;  %v1843_v53 = vpack.i.bf16 %v888_v39, %v885_v38  ;;  %v1853_v58 = vpack.i.bf16 %v892_v0, %v890_v63  ;;  %v1025_v14 = vld [vmem:[#allocation4 + $0x8] sm:$0xfc]  ;;  %v840_v17 = vsel %vm830_vm1, %v2536_v21, %v839_v4  ;;  %v1123_v52 = vrot.slane %v1097_v59, 2  ;;  %1407 = vmatpush.msra.mxu3 %v1250_v29  ;;  %v1248_v4 = vld [vmem:[%s3088_s2 + $0x160] sm:$0xff]  ;;  %v1103_v8 = vld [vmem:[#allocation4 + $0x38] sm:$0xfc] }
 0x384   :  { %v1051_v23 = vrot.slane %v1025_v14, 2  ;;  %v957_v40 = vsel %vm830_vm1, %v955_v33, %v2536_v21  ;;  %v1126_v49 = vrot.slane %v1100_v36, 2  ;;  %v1054_v54 = vrot.slane %v1028_v43, 2  ;;  %v1247_v7 = vld [vmem:[%s3088_s2 + $0x158] sm:$0xff]  ;;  %v1102_v59 = vld [vmem:[#allocation4 + $0x30] sm:$0xfc] }
 0x385   :  { %1839 = vrot.lane.b32.xlu0 %v1838_v16, %s1925_s21  ;;  %v1124_v16 = vrot.slane %v2497_v50, 2  ;;  %v928_v50 = vld [vmem:[#allocation4 + $0x38] sm:$0xfe]  ;;  %v1056_v2 = vrot.slane %v1029_v44, 2  ;;  %v963_v1 = vrot.slane %v932_v47, 1  ;;  %1408 = vmatpush.msra.mxu3 %v1249_v60  ;;  %v1246_v15 = vld [vmem:[%s3088_s2 + $0x150] sm:$0xff] }
 0x386   :  { %v958_v34 = vrot.slane %v928_v50, 1  ;;  %v1127_v63 = vsel %vm1005_vm2, %v2527_v13, %v1126_v49  ;;  %v1031_v14 = vld [vmem:[#allocation4 + $0x38] sm:$0xfc]  ;;  %v1035_v18 = vld [vmem:[#allocation4 + $0x58] sm:$0x3]  ;;  %v1133_v19 = vrot.slane %v1103_v8, 2 }
 0x387   :  { %1373 = vmatmul.f32.gmra.mxu0 %v723_v11  ;;  %v954_v11 = vsel %vm830_vm1, %v2504_v56, %v953_v6  ;;  %v1225_v56 = vld [vmem:[%s3088_s2 + $0xa8] sm:$0xff]  ;;  %v1125_v30 = vsel %vm1005_vm2, %v1123_v52, %v1124_v16  ;;  %v1053_v32 = vsel %vm1005_vm2, %v1051_v23, %v1124_v16  ;;  %v1055_v6 = vsel %vm1005_vm2, %v2527_v13, %v1054_v54  ;;  %v1030_v13 = vld [vmem:[#allocation4 + $0x30] sm:$0xfc]  ;;  %v1106_v29 = vld [vmem:[#allocation4 + $0x50] sm:$0x3] }
 0x388   :  { %v1858_v20 = vpack.i.bf16 %v954_v11, %v952_v10  ;;  %1387 = vmatpush.msra.mxu2 %v1225_v56  ;;  %v1868_v38 = vpack.i.bf16 %v1125_v30, %v1122_v26  ;;  %v1863_v39 = vpack.i.bf16 %v1053_v32, %v1050_v31  ;;  %v960_v42 = vsel %vm830_vm1, %v958_v34, %v2539_v22  ;;  %v1244_v50 = vld [vmem:[%s3088_s2 + $0x140] sm:$0xff]  ;;  %v1107_v30 = vld [vmem:[#allocation4 + $0x58] sm:$0x3]  ;;  %v1243_v31 = vld [vmem:[%s3088_s2 + $0x138] sm:$0xff] }
 0x389   :  { %v1873_v51 = vpack.i.bf16 %v960_v42, %v957_v40  ;;  %v1057_v55 = vsel %vm1005_vm2, %v1124_v16, %v1056_v2  ;;  %1409 = vmatpush.msra.mxu3 %v1248_v4  ;;  %v964_v11 = vsel %vm830_vm1, %v2539_v22, %v963_v1  ;;  %v1130_v52 = vrot.slane %v1102_v59, 2  ;;  %v1242_v36 = vld [vmem:[%s3088_s2 + $0x130] sm:$0xff]  ;;  %v1240_v42 = vld [vmem:[%s3088_s2 + $0x120] sm:$0xff]  ;;  %v1283_v49 = vld [vmem:[%s3088_s2 + $0x278] sm:$0xff] }
 0x38a   :  { %1829 = vrot.lane.b32.xlu2 %v1828_v37, %s1927_s30  ;;  %1824 = vrot.lane.b32.xlu1 %v1828_v37, %s1925_s21  ;;  %v1101_v37 = vld [vmem:[#allocation4 + $0x28] sm:$0x3]  ;;  %v1058_v56 = vrot.slane %v1030_v13, 2  ;;  %v1066_v24 = vrot.slane %v1035_v18, 2  ;;  %v1238_v47 = vld [vmem:[%s3088_s2 + $0x110] sm:$0xff]  ;;  %v1281_v54 = vld [vmem:[%s3088_s2 + $0x268] sm:$0xff] }
 0x38b   :  { %1457 = vmatmul.f32.gmra.mxu1 %v838_v46  ;;  %1388 = vmatpush.msra.mxu2 %v1224_v27  ;;  %v931_v46 = vld [vmem:[#allocation4 + $0x50] sm:$0x1]  ;;  %v1132_v23 = vsel %vm1005_vm2, %v1130_v52, %v2560_v41  ;;  %v1315_v2 = vld [vmem:[%s3088_s2 + $0x378] sm:$0xff]  ;;  %v1314_v60 = vld [vmem:[%s3088_s2 + $0x370] sm:$0xff] }
 0x38c   :  { %v961_v0 = vrot.slane %v931_v46, 1  ;;  %1410 = vmatpush.msra.mxu3 %v1247_v7  ;;  %v1060_v26 = vsel %vm1005_vm2, %v1058_v56, %v2560_v41  ;;  %1464 = vmatpush.msrb.mxu0 %v1283_v49  ;;  %v1313_v1 = vld [vmem:[%s3088_s2 + $0x368] sm:$0xff]  ;;  %v1311_v59 = vld [vmem:[%s3088_s2 + $0x358] sm:$0xff]  ;;  %v1276_v8 = vld [vmem:[%s3088_s2 + $0x240] sm:$0xff] }
 0x38d   :  { %1844 = vrot.lane.b32.xlu0 %v1843_v53, %s1925_s21  ;;  %1389 = vmatpush.msra.mxu2 %v1223_v35  ;;  %v1128_v53 = vrot.slane %v1101_v37, 2  ;;  %v1136_v37 = vrot.slane %v1106_v29, 2  ;;  %v1277_v7 = vld [vmem:[%s3088_s2 + $0x248] sm:$0xff]  ;;  %v1308_v13 = vld [vmem:[%s3088_s2 + $0x340] sm:$0xff]  ;;  %v1298_v18 = vld [vmem:[%s3088_s2 + $0x2f0] sm:$0xff] }
 0x38e   :  { %v962_v10 = vsel %vm830_vm1, %v2536_v21, %v961_v0  ;;  %v1245_v21 = vld [vmem:[%s3088_s2 + $0x148] sm:$0xff]  ;;  %1411 = vmatpush.msra.mxu3 %v1246_v15  ;;  %v1279_v0 = vld [vmem:[%s3088_s2 + $0x258] sm:$0xff]  ;;  %v1306_v52 = vld [vmem:[%s3088_s2 + $0x330] sm:$0xff] }
 0x38f   :  { %1390 = vmatpush.msra.mxu2 %v1222_v45  ;;  %v1129_v5 = vsel %vm1005_vm2, %v1124_v16, %v1128_v53  ;;  %v1134_v16 = vrot.slane %v2525_v12, 2  ;;  %v1888_v22 = vpack.i.bf16 %v964_v11, %v962_v10  ;;  %v1137_v43 = vsel %vm1005_vm2, %v2560_v41, %v1136_v37  ;;  %v1239_v45 = vld [vmem:[%s3088_s2 + $0x118] sm:$0xff]  ;;  %v1282_v53 = vld [vmem:[%s3088_s2 + $0x270] sm:$0xff]  ;;  %v1309_v10 = vld [vmem:[%s3088_s2 + $0x348] sm:$0xff] }
 0x390   :  { %1412 = vmatpush.msra.mxu3 %v1245_v21  ;;  %1465 = vmatpush.msrb.mxu0 %v1282_v53  ;;  %v1274_v11 = vld [vmem:[%s3088_s2 + $0x230] sm:$0xff]  ;;  %v1299_v15 = vld [vmem:[%s3088_s2 + $0x2f8] sm:$0xff]  ;;  %v1297_v21 = vld [vmem:[%s3088_s2 + $0x2e8] sm:$0xff] }
 0x391   :  { %1391 = vmatpush.msra.mxu2 %v1221_v57  ;;  %v1135_v25 = vsel %vm1005_vm2, %v1133_v19, %v1134_v16  ;;  %v1067_v35 = vsel %vm1005_vm2, %v1134_v16, %v1066_v24  ;;  %v1280_v57 = vld [vmem:[%s3088_s2 + $0x260] sm:$0xff]  ;;  %v1305_v19 = vld [vmem:[%s3088_s2 + $0x328] sm:$0xff]  ;;  %v1270_v56 = vld [vmem:[%s3088_s2 + $0x210] sm:$0xff] }
 0x392   :  { %1854 = vrot.lane.b32.xlu2 %v1853_v58, %s1925_s21  ;;  %1849 = vrot.lane.b32.xlu1 %v1848_v9, %s1927_s30  ;;  %v1883_v58 = vpack.i.bf16 %v1129_v5, %v1127_v63  ;;  %v1878_v9 = vpack.i.bf16 %v1057_v55, %v1055_v6  ;;  %v1898_v32 = vpack.i.bf16 %v1135_v25, %v1132_v23  ;;  %v1278_v6 = vld [vmem:[%s3088_s2 + $0x250] sm:$0xff]  ;;  %v1312_v55 = vld [vmem:[%s3088_s2 + $0x360] sm:$0xff] }
 0x393   :  { %1460 = vmatmul.f32.gmra.mxu1 %v840_v17  ;;  %1392 = vmatpush.msra.mxu2 %v1220_v3  ;;  %v1034_v17 = vld [vmem:[#allocation4 + $0x50] sm:$0x3]  ;;  %v1295_v24 = vld [vmem:[%s3088_s2 + $0x2d8] sm:$0xff] }
 0x394   :  { %v1064_v12 = vrot.slane %v1034_v17, 2  ;;  %1413 = vmatpush.msra.mxu3 %v1244_v50  ;;  %1466 = vmatpush.msrb.mxu0 %v1281_v54  ;;  %v1272_v17 = vld [vmem:[%s3088_s2 + $0x220] sm:$0xff]  ;;  %v1303_v50 = vld [vmem:[%s3088_s2 + $0x318] sm:$0xff]  ;;  %v1326_v54 = vld [vmem:[%s3088_s2 + $0x3d0] sm:$0xff] }
 0x395   :  { %1859 = vrot.lane.b32.xlu0 %v1858_v20, %s1927_s30  ;;  %v1061_v20 = vrot.slane %v1031_v14, 2  ;;  %v1273_v14 = vld [vmem:[%s3088_s2 + $0x228] sm:$0xff]  ;;  %1493 = vmatpush.msrb.mxu2 %v1299_v15  ;;  %v1304_v23 = vld [vmem:[%s3088_s2 + $0x320] sm:$0xff]  ;;  %v1331_v25 = vld [vmem:[%s3088_s2 + $0x3f8] sm:$0xff] }
 0x396   :  { %v1065_v34 = vsel %vm1005_vm2, %v2560_v41, %v1064_v12  ;;  %1414 = vmatpush.msra.mxu3 %v1243_v31  ;;  %v1237_v41 = vld [vmem:[%s3088_s2 + $0x108] sm:$0xff]  ;;  %1467 = vmatpush.msrb.mxu0 %v1280_v57  ;;  %v1347_v37 = vld [vmem:[%s3088_s2 + $0x478] sm:$0xff]  ;;  %v1344_v53 = vld [vmem:[%s3088_s2 + $0x460] sm:$0xff] }
 0x397   :  { %v1063_v27 = vsel %vm1005_vm2, %v1061_v20, %v1134_v16  ;;  %v1903_v40 = vpack.i.bf16 %v1067_v35, %v1065_v34  ;;  %1494 = vmatpush.msrb.mxu2 %v1298_v18  ;;  %v1296_v20 = vld [vmem:[%s3088_s2 + $0x2e0] sm:$0xff]  ;;  %v1269_v12 = vld [vmem:[%s3088_s2 + $0x208] sm:$0xff]  ;;  %1551 = vmatpush.msra.mxu1 %v1331_v25  ;;  %v1343_v57 = vld [vmem:[%s3088_s2 + $0x458] sm:$0xff] }
 0x398   :  { %v1893_v33 = vpack.i.bf16 %v1063_v27, %v1060_v26  ;;  %1415 = vmatpush.msra.mxu3 %v1242_v36  ;;  %1468 = vmatpush.msrb.mxu0 %v1279_v0  ;;  %v1268_v26 = vld [vmem:[%s3088_s2 + $0x200] sm:$0xff]  ;;  %v1294_v27 = vld [vmem:[%s3088_s2 + $0x2d0] sm:$0xff]  ;;  %v1293_v34 = vld [vmem:[%s3088_s2 + $0x2c8] sm:$0xff] }
 0x399   :  { %1495 = vmatpush.msrb.mxu2 %v1297_v21  ;;  %v1301_v36 = vld [vmem:[%s3088_s2 + $0x308] sm:$0xff]  ;;  %v1284_v15 = vld [vmem:[%s3088_s2 + $0x280] sm:$0xff]  ;;  %v1319_v21 = vld [vmem:[%s3088_s2 + $0x398] sm:$0xff] }
 0x39a   :  { %1869 = vrot.lane.b32.xlu2 %v1868_v38, %s1927_s30  ;;  %1864 = vrot.lane.b32.xlu1 %v1863_v39, %s1925_s21  ;;  %v1138_v38 = vrot.slane %v1107_v30, 2  ;;  %v1241_v39 = vld [vmem:[%s3088_s2 + $0x128] sm:$0xff]  ;;  %v1302_v30 = vld [vmem:[%s3088_s2 + $0x310] sm:$0xff] }
 0x39b   :  { %1416 = vmatpush.msra.mxu3 %v1241_v39  ;;  %1469 = vmatpush.msrb.mxu0 %v1278_v6  ;;  %v1329_v39 = vld [vmem:[%s3088_s2 + $0x3e8] sm:$0xff]  ;;  %v1320_v18 = vld [vmem:[%s3088_s2 + $0x3a0] sm:$0xff] }
 0x39c   :  { %v1139_v44 = vsel %vm1005_vm2, %v1134_v16, %v1138_v38  ;;  %v1307_v16 = vld [vmem:[%s3088_s2 + $0x338] sm:$0xff]  ;;  %1496 = vmatpush.msrb.mxu2 %v1296_v20  ;;  %v1325_v0 = vld [vmem:[%s3088_s2 + $0x3c8] sm:$0xff]  ;;  %v1318_v20 = vld [vmem:[%s3088_s2 + $0x390] sm:$0xff] }
 0x39d   :  { %1874 = vrot.lane.b32.xlu0 %v1873_v51, %s1927_s30  ;;  %1417 = vmatpush.msra.mxu3 %v1240_v42  ;;  %v1908_v46 = vpack.i.bf16 %v1139_v44, %v1137_v43  ;;  %v1236_v51 = vld [vmem:[%s3088_s2 + $0x100] sm:$0xff]  ;;  %v1346_v43 = vld [vmem:[%s3088_s2 + $0x470] sm:$0xff]  ;;  %v1341_v6 = vld [vmem:[%s3088_s2 + $0x448] sm:$0xff] }
 0x39e   :  { %1470 = vmatpush.msrb.mxu0 %v1277_v7  ;;  %1497 = vmatpush.msrb.mxu2 %v1295_v24  ;;  %v1300_v42 = vld [vmem:[%s3088_s2 + $0x300] sm:$0xff] }
 0x39f   :  { %1418 = vmatpush.msra.mxu3 %v1239_v45  ;;  %v1328_v44 = vld [vmem:[%s3088_s2 + $0x3e0] sm:$0xff]  ;;  %v1291_v45 = vld [vmem:[%s3088_s2 + $0x2b8] sm:$0xff] }
 0x3a0   :  { %1471 = vmatpush.msrb.mxu0 %v1276_v8  ;;  %1498 = vmatpush.msrb.mxu2 %v1294_v27  ;;  %v1286_v8 = vld [vmem:[%s3088_s2 + $0x290] sm:$0xff] }
 0x3a1   :  { %1419 = vmatpush.msra.mxu3 %v1238_v47  ;;  %v1327_v47 = vld [vmem:[%s3088_s2 + $0x3d8] sm:$0xff]  ;;  %v1334_v27 = vld [vmem:[%s3088_s2 + $0x410] sm:$0xff] }
 0x3a2   :  { %1884 = vrot.lane.b32.xlu2 %v1883_v58, %s1927_s30  ;;  %1879 = vrot.lane.b32.xlu1 %v1878_v9, %s1925_s21  ;;  %v1310_v58 = vld [vmem:[%s3088_s2 + $0x350] sm:$0xff]  ;;  %v1275_v9 = vld [vmem:[%s3088_s2 + $0x238] sm:$0xff] }
 0x3a3   :  { %1420 = vmatpush.msra.mxu3 %v1237_v41  ;;  %1472 = vmatpush.msrb.mxu0 %v1275_v9  ;;  %v1322_v9 = vld [vmem:[%s3088_s2 + $0x3b0] sm:$0xff] }
 0x3a4   :  { %1499 = vmatpush.msrb.mxu2 %v1293_v34  ;;  %v1333_v34 = vld [vmem:[%s3088_s2 + $0x408] sm:$0xff] }
 0x3a5   :  { %1889 = vrot.lane.b32.xlu0 %v1888_v22, %s1927_s30  ;;  %1421 = vmatpush.msra.mxu3 %v1236_v51  ;;  %v1271_v22 = vld [vmem:[%s3088_s2 + $0x218] sm:$0xff]  ;;  %v1290_v51 = vld [vmem:[%s3088_s2 + $0x2b0] sm:$0xff] }
 0x3a6   :  { %1473 = vmatpush.msrb.mxu0 %v1274_v11  ;;  %v1339_v11 = vld [vmem:[%s3088_s2 + $0x438] sm:$0xff] }
 0x3a7   :  { %1522 = vmatpush.msrb.mxu3 %v1315_v2  ;;  %v1289_v2 = vld [vmem:[%s3088_s2 + $0x2a8] sm:$0xff] }
 0x3a8   :  { %1474 = vmatpush.msrb.mxu0 %v1273_v14  ;;  %v1321_v14 = vld [vmem:[%s3088_s2 + $0x3a8] sm:$0xff] }
 0x3a9   :  { %1523 = vmatpush.msrb.mxu3 %v1314_v60 }
 0x3aa   :  { %1899 = vrot.lane.b32.xlu2 %v1898_v32, %s1927_s30  ;;  %1894 = vrot.lane.b32.xlu1 %v1893_v33, %s1925_s21  ;;  %v1330_v33 = vld [vmem:[%s3088_s2 + $0x3f0] sm:$0xff] }
 0x3ab   :  { %1524 = vmatpush.msrb.mxu3 %v1313_v1  ;;  %1475 = vmatpush.msrb.mxu0 %v1272_v17  ;;  %v1288_v1 = vld [vmem:[%s3088_s2 + $0x2a0] sm:$0xff] }
 0x3ac   :  { %1552 = vmatpush.msra.mxu1 %v1330_v33 }
 0x3ad   :  { %1904 = vrot.lane.b32.xlu0 %v1903_v40, %s1925_s21  ;;  %1525 = vmatpush.msrb.mxu3 %v1312_v55  ;;  %v1292_v40 = vld [vmem:[%s3088_s2 + $0x2c0] sm:$0xff]  ;;  %v1323_v55 = vld [vmem:[%s3088_s2 + $0x3b8] sm:$0xff] }
 0x3ae   :  { %1476 = vmatpush.msrb.mxu0 %v1271_v22  ;;  %1553 = vmatpush.msra.mxu1 %v1329_v39 }
 0x3af   :  { %1526 = vmatpush.msrb.mxu3 %v1311_v59  ;;  %1500 = vmatpush.msrb.mxu2 %v1292_v40 }
 0x3b0   :  { %1477 = vmatpush.msrb.mxu0 %v1270_v56  ;;  %1554 = vmatpush.msra.mxu1 %v1328_v44  ;;  %v1336_v56 = vld [vmem:[%s3088_s2 + $0x420] sm:$0xff] }
 0x3b1   :  { %1527 = vmatpush.msrb.mxu3 %v1310_v58  ;;  %1501 = vmatpush.msrb.mxu2 %v1291_v45  ;;  %v1340_v58 = vld [vmem:[%s3088_s2 + $0x440] sm:$0xff] }
 0x3b2   :  { %1909 = vrot.lane.b32.xlu1 %v1908_v46, %s1927_s30  ;;  %1478 = vmatpush.msrb.mxu0 %v1269_v12  ;;  %v1345_v46 = vld [vmem:[%s3088_s2 + $0x468] sm:$0xff] }
 0x3b3   :  { %1528 = vmatpush.msrb.mxu3 %v1309_v10  ;;  %1555 = vmatpush.msra.mxu1 %v1327_v47  ;;  %v1285_v10 = vld [vmem:[%s3088_s2 + $0x288] sm:$0xff] }
 0x3b4   :  { %1479 = vmatpush.msrb.mxu0 %v1268_v26  ;;  %1502 = vmatpush.msrb.mxu2 %v1290_v51  ;;  %v1317_v26 = vld [vmem:[%s3088_s2 + $0x388] sm:$0xff] }
 0x3b5   :  { %1529 = vmatpush.msrb.mxu3 %v1308_v13  ;;  %1556 = vmatpush.msra.mxu1 %v1326_v54 }
 0x3b6   :  { %1580 = vmatpush.msra.mxu0 %v1347_v37  ;;  %1503 = vmatpush.msrb.mxu2 %v1289_v2  ;;  %v2968_v37 = vld [vmem:[%s3085_s8] sm:$0xff] }
 0x3b7   :  { %1530 = vmatpush.msrb.mxu3 %v1307_v16  ;;  %1557 = vmatpush.msra.mxu1 %v1325_v0  ;;  %v1338_v16 = vld [vmem:[%s3088_s2 + $0x430] sm:$0xff] }
 0x3b8   :  { %1581 = vmatpush.msra.mxu0 %v1346_v43  ;;  %1504 = vmatpush.msrb.mxu2 %v1288_v1 }
 0x3b9   :  { %1531 = vmatpush.msrb.mxu3 %v1306_v52  ;;  %v1337_v52 = vld [vmem:[%s3088_s2 + $0x428] sm:$0xff] }
 0x3ba   :  { %v1795_v63 = vpop.permute.xlu2 %1794  ;;  %1582 = vmatpush.msra.mxu0 %v1345_v46 }
 0x3bb   :  { %v1797_v3 = vunpack.i.h.bf16 %v1795_v63  ;;  %v1796_v4 = vunpack.i.l.bf16 %v1795_v63  ;;  %1532 = vmatpush.msrb.mxu3 %v1305_v19 }
 0x3bc   :  { %1583 = vmatpush.msra.mxu0 %v1344_v53 }
 0x3bd   :  { %v761_v5 = vsel %vm760_vm3, %v1796_v4, %v1797_v3  ;;  %1533 = vmatpush.msrb.mxu3 %v1304_v23  ;;  %v1342_v3 = vld [vmem:[%s3088_s2 + $0x450] sm:$0xff]  ;;  %v1324_v4 = vld [vmem:[%s3088_s2 + $0x3c0] sm:$0xff]  ;;  %v1335_v23 = vld [vmem:[%s3088_s2 + $0x418] sm:$0xff] }
 0x3be   :  { %1393 = vmatmul.f32.vlgmr.msra.gmra.mxu2 %v761_v5  ;;  %1584 = vmatpush.msra.mxu0 %v1343_v57  ;;  %v1287_v5 = vld [vmem:[%s3088_s2 + $0x298] sm:$0xff] }
 0x3bf   :  { %1534 = vmatpush.msrb.mxu3 %v1303_v50  ;;  %1558 = vmatpush.msra.mxu1 %v1324_v4 }
 0x3c0   :  { %1585 = vmatpush.msra.mxu0 %v1342_v3  ;;  %1505 = vmatpush.msrb.mxu2 %v1287_v5 }
 0x3c1   :  { %1535 = vmatpush.msrb.mxu3 %v1302_v30  ;;  %1559 = vmatpush.msra.mxu1 %v1323_v55 }
 0x3c2   :  { %1586 = vmatpush.msra.mxu0 %v1341_v6  ;;  %1506 = vmatpush.msrb.mxu2 %v1286_v8 }
 0x3c3   :  { %1536 = vmatpush.msrb.mxu3 %v1301_v36  ;;  %1560 = vmatpush.msra.mxu1 %v1322_v9 }
 0x3c4   :  { %1587 = vmatpush.msra.mxu0 %v1340_v58  ;;  %1507 = vmatpush.msrb.mxu2 %v1285_v10 }
 0x3c5   :  { %1537 = vmatpush.msrb.mxu3 %v1300_v42  ;;  %1561 = vmatpush.msra.mxu1 %v1321_v14 }
 0x3c6   :  { %1588 = vmatpush.msra.mxu0 %v1339_v11  ;;  %1508 = vmatpush.msrb.mxu2 %v1284_v15 }
 0x3c7   :  { %1562 = vmatpush.msra.mxu1 %v1320_v18 }
 0x3c8   :  { %1589 = vmatpush.msra.mxu0 %v1338_v16 }
 0x3c9   :  { %1563 = vmatpush.msra.mxu1 %v1319_v21 }
 0x3ca   :  { %1590 = vmatpush.msra.mxu0 %v1337_v52 }
 0x3cb   :  { %1564 = vmatpush.msra.mxu1 %v1318_v20 }
 0x3cc   :  { %1591 = vmatpush.msra.mxu0 %v1336_v56 }
 0x3cd   :  { %1565 = vmatpush.msra.mxu1 %v1317_v26 }
 0x3ce   :  { %1592 = vmatpush.msra.mxu0 %v1335_v23 }
 0x3d0   :  { %1593 = vmatpush.msra.mxu0 %v1334_v27 }
 0x3d2   :  { %v1800_v29 = vpop.permute.xlu0 %1799  ;;  %1594 = vmatpush.msra.mxu0 %v1333_v34 }
 0x3d3   :  { %v1802_v31 = vunpack.i.h.bf16 %v1800_v29  ;;  %v1801_v32 = vunpack.i.l.bf16 %v1800_v29  ;;  %v1316_v29 = vld [vmem:[%s3088_s2 + $0x380] sm:$0xff] }
 0x3d4   :  { %v1815_v35 = vpop.permute.xlu2 %1814  ;;  %1566 = vmatpush.msra.mxu1 %v1316_v29 }
 0x3d5   :  { %v806_v38 = vsel %vm805_vm4, %v1801_v32, %v1802_v31  ;;  %v1817_v41 = vunpack.i.h.bf16 %v1815_v35  ;;  %v1816_v49 = vunpack.i.l.bf16 %v1815_v35  ;;  %v1332_v35 = vld [vmem:[%s3088_s2 + $0x400] sm:$0xff] }
 0x3d6   :  { %1422 = vmatmul.f32.vlgmr.msra.gmra.mxu3 %v806_v38  ;;  %1726 = vmatpush.msrb.mxu1 %v2968_v37 }
 0x3d7   :  { %v807_v63 = vsel %vm805_vm4, %v1816_v49, %v1817_v41  ;;  %1595 = vmatpush.msra.mxu0 %v1332_v35 }
 0x3dc   :  { %v1820_v60 = vpop.permute.xlu2 %1819 }
 0x3dd   :  { %v1822_v7 = vunpack.i.h.bf16 %v1820_v60  ;;  %v1821_v59 = vunpack.i.l.bf16 %v1820_v60 }
 0x3de   :  { %1425 = vmatmul.f32.gmra.mxu3 %v807_v63 }
 0x3df   :  { %v808_v13 = vsel %vm805_vm4, %v1821_v59, %v1822_v7 }
 0x3e4   :  { %v1830_v17 = vpop.permute.xlu2 %1829 }
 0x3e5   :  { %v1832_v22 = vunpack.i.h.bf16 %v1830_v17  ;;  %v1831_v19 = vunpack.i.l.bf16 %v1830_v17 }
 0x3e6   :  { %1428 = vmatmul.f32.gmra.mxu3 %v808_v13 }
 0x3e7   :  { %v809_v25 = vsel %vm805_vm4, %v1831_v19, %v1832_v22 }
 0x3ec   :  { %v1805_v12 = vpop.permute.xlu1 %1804  ;;  %v1855_v41 = vpop.permute.xlu2 %1854 }
 0x3ed   :  { %v1807_v24 = vunpack.i.h.bf16 %v1805_v12  ;;  %v1806_v50 = vunpack.i.l.bf16 %v1805_v12  ;;  %v1857_v1 = vunpack.i.h.bf16 %v1855_v41  ;;  %v1856_v3 = vunpack.i.l.bf16 %v1855_v41 }
 0x3ee   :  { %1431 = vmatmul.f32.gmra.mxu3 %v809_v25 }
 0x3ef   :  { %v1835_v30 = vpop.permute.xlu0 %1834  ;;  %v762_v31 = vsel %vm760_vm3, %v1806_v50, %v1807_v24  ;;  %v912_v6 = vsel %vm760_vm3, %v1856_v3, %v1857_v1  ;;  %v1646_v3 = vld [vmem:[%s3084_s7 + $0x78] sm:$0xff] }
 0x3f0   :  { %v1837_v32 = vunpack.i.h.bf16 %v1835_v30  ;;  %v1836_v33 = vunpack.i.l.bf16 %v1835_v30  ;;  %1396 = vmatmul.f32.gmra.mxu2 %v762_v31  ;;  %1667 = vmatpush.msra.mxu3 %v1646_v3 }
 0x3f1   :  { %1647 = vmatpush.msra.mxu2 %v1646_v3 }
 0x3f2   :  { %v909_v36 = vsel %vm760_vm3, %v1836_v33, %v1837_v32 }
 0x3f3   :  { %1480 = vmatmul.f32.vlgmr.msrb.gmra.mxu0 %v909_v36 }
 0x3f4   :  { %v1810_v38 = vpop.permute.xlu1 %1809  ;;  %v1870_v4 = vpop.permute.xlu2 %1869 }
 0x3f5   :  { %v1812_v39 = vunpack.i.h.bf16 %v1810_v38  ;;  %v1811_v40 = vunpack.i.l.bf16 %v1810_v38  ;;  %v1872_v9 = vunpack.i.h.bf16 %v1870_v4  ;;  %v1871_v10 = vunpack.i.l.bf16 %v1870_v4  ;;  %v1645_v4 = vld [vmem:[%s3084_s7 + $0x70] sm:$0xff] }
 0x3f6   :  { %1538 = vmatmul.f32.vlgmr.msrb.gmra.mxu3 %v2550_v28  ;;  %1648 = vmatpush.msra.mxu2 %v1645_v4 }
 0x3f7   :  { %v1840_v42 = vpop.permute.xlu0 %1839  ;;  %v763_v43 = vsel %vm760_vm3, %v1811_v40, %v1812_v39  ;;  %v1156_v15 = vsel %vm805_vm4, %v1871_v10, %v1872_v9  ;;  %1668 = vmatpush.msra.mxu3 %v1645_v4  ;;  %v1641_v10 = vld [vmem:[%s3084_s7 + $0x50] sm:$0xff] }
 0x3f8   :  { %v1842_v44 = vunpack.i.h.bf16 %v1840_v42  ;;  %v1841_v45 = vunpack.i.l.bf16 %v1840_v42  ;;  %1399 = vmatmul.f32.gmra.mxu2 %v763_v43  ;;  %v1452_v41 = vpop.f32.mrf.mxu1 }
 0x3fa   :  { %v910_v46 = vsel %vm760_vm3, %v1841_v45, %v1842_v44  ;;  %v1365_v44 = vpop.f32.mrf.mxu0 }
 0x3fb   :  { %1483 = vmatmul.f32.gmra.mxu0 %v910_v46 }
 0x3fc   :  { %v1825_v47 = vpop.permute.xlu1 %1824  ;;  %v1885_v14 = vpop.permute.xlu2 %1884 }
 0x3fd   :  { %v1827_v49 = vunpack.i.h.bf16 %v1825_v47  ;;  %v1826_v51 = vunpack.i.l.bf16 %v1825_v47  ;;  %v1887_v22 = vunpack.i.h.bf16 %v1885_v14  ;;  %v1886_v19 = vunpack.i.l.bf16 %v1885_v14 }
 0x3fe   :  { %1541 = vmatmul.f32.gmra.mxu3 %v2571_v48 }
 0x3ff   :  { %v1845_v53 = vpop.permute.xlu0 %1844  ;;  %v764_v54 = vsel %vm760_vm3, %v1826_v51, %v1827_v49  ;;  %v1157_v23 = vsel %vm805_vm4, %v1886_v19, %v1887_v22 }
 0x400   :  { %v1847_v2 = vunpack.i.h.bf16 %v1845_v53  ;;  %v1846_v28 = vunpack.i.l.bf16 %v1845_v53  ;;  %1402 = vmatmul.f32.gmra.mxu2 %v764_v54 }
 0x402   :  { %v911_v57 = vsel %vm760_vm3, %v1846_v28, %v1847_v2  ;;  %v1368_v45 = vpop.f32.mrf.mxu0  ;;  %v1455_v2 = vpop.f32.mrf.mxu1 }
 0x403   :  { %1486 = vmatmul.f32.gmra.mxu0 %v911_v57 }
 0x404   :  { %v1850_v60 = vpop.permute.xlu1 %1849  ;;  %v1900_v12 = vpop.permute.xlu2 %1899 }
 0x405   :  { %v1852_v63 = vunpack.i.h.bf16 %v1850_v60  ;;  %v1851_v0 = vunpack.i.l.bf16 %v1850_v60  ;;  %v1902_v29 = vunpack.i.h.bf16 %v1900_v12  ;;  %v1901_v30 = vunpack.i.l.bf16 %v1900_v12 }
 0x406   :  { %1544 = vmatmul.f32.gmra.mxu3 %v2577_v61 }
 0x407   :  { %v1860_v5 = vpop.permute.xlu0 %1859  ;;  %v981_v48 = vsel %vm805_vm4, %v1851_v0, %v1852_v63  ;;  %v1158_v34 = vsel %vm805_vm4, %v1901_v30, %v1902_v29 }
 0x408   :  { %1509 = vmatmul.f32.vlgmr.msrb.gmra.mxu2 %v981_v48  ;;  %v1862_v55 = vunpack.i.h.bf16 %v1860_v5  ;;  %v1861_v7 = vunpack.i.l.bf16 %v1860_v5  ;;  %v1644_v48 = vld [vmem:[%s3084_s7 + $0x68] sm:$0xff] }
 0x409   :  { %1649 = vmatpush.msra.mxu2 %v1644_v48  ;;  %1669 = vmatpush.msra.mxu3 %v1644_v48 }
 0x40a   :  { %v982_v61 = vsel %vm805_vm4, %v1861_v7, %v1862_v55  ;;  %v1371_v46 = vpop.f32.mrf.mxu0  ;;  %v1458_v63 = vpop.f32.mrf.mxu1  ;;  %v1643_v7 = vld [vmem:[%s3084_s7 + $0x60] sm:$0xff] }
 0x40b   :  { %1489 = vmatmul.f32.gmra.mxu0 %v912_v6  ;;  %1650 = vmatpush.msra.mxu2 %v1643_v7 }
 0x40c   :  { %v1865_v59 = vpop.permute.xlu1 %1864  ;;  %1670 = vmatpush.msra.mxu3 %v1643_v7 }
 0x40d   :  { %v1867_v8 = vunpack.i.h.bf16 %v1865_v59  ;;  %v1866_v58 = vunpack.i.l.bf16 %v1865_v59  ;;  %v1642_v59 = vld [vmem:[%s3084_s7 + $0x58] sm:$0xff] }
 0x40e   :  { %1547 = vmatmul.f32.gmra.mxu3 %v2581_v62  ;;  %1651 = vmatpush.msra.mxu2 %v1642_v59 }
 0x40f   :  { %v1875_v11 = vpop.permute.xlu0 %1874  ;;  %v1084_v13 = vsel %vm760_vm3, %v1866_v58, %v1867_v8  ;;  %1671 = vmatpush.msra.mxu3 %v1642_v59 }
 0x410   :  { %1512 = vmatmul.f32.gmra.mxu2 %v982_v61  ;;  %1567 = vmatmul.f32.vlgmr.msra.gmra.mxu1 %v1084_v13  ;;  %v1877_v16 = vunpack.i.h.bf16 %v1875_v11  ;;  %v1876_v17 = vunpack.i.l.bf16 %v1875_v11  ;;  %v1640_v11 = vld [vmem:[%s3084_s7 + $0x48] sm:$0xff] }
 0x411   :  { %1652 = vmatpush.msra.mxu2 %v1641_v10  ;;  %1672 = vmatpush.msra.mxu3 %v1641_v10 }
 0x412   :  { %v983_v62 = vsel %vm805_vm4, %v1876_v17, %v1877_v16  ;;  %v1374_v49 = vpop.f32.mrf.mxu0  ;;  %v1461_v55 = vpop.f32.mrf.mxu1 }
 0x413   :  { %1596 = vmatmul.f32.vlgmr.msra.gmra.mxu0 %v1156_v15  ;;  %1653 = vmatpush.msra.mxu2 %v1640_v11 }
 0x414   :  { %v1880_v18 = vpop.permute.xlu1 %1879  ;;  %1673 = vmatpush.msra.mxu3 %v1640_v11 }
 0x415   :  { %v1882_v52 = vunpack.i.h.bf16 %v1880_v18  ;;  %v1881_v21 = vunpack.i.l.bf16 %v1880_v18 }
 0x417   :  { %v1890_v56 = vpop.permute.xlu0 %1889  ;;  %v1085_v20 = vsel %vm760_vm3, %v1881_v21, %v1882_v52 }
 0x418   :  { %1515 = vmatmul.f32.gmra.mxu2 %v983_v62  ;;  %1570 = vmatmul.f32.gmra.mxu1 %v1085_v20  ;;  %v1892_v24 = vunpack.i.h.bf16 %v1890_v56  ;;  %v1891_v50 = vunpack.i.l.bf16 %v1890_v56  ;;  %v1639_v20 = vld [vmem:[%s3084_s7 + $0x40] sm:$0xff] }
 0x419   :  { %1654 = vmatpush.msra.mxu2 %v1639_v20  ;;  %1674 = vmatpush.msra.mxu3 %v1639_v20 }
 0x41a   :  { %v984_v31 = vsel %vm805_vm4, %v1891_v50, %v1892_v24 }
 0x41b   :  { %1599 = vmatmul.f32.gmra.mxu0 %v1157_v23  ;;  %v1638_v23 = vld [vmem:[%s3084_s7 + $0x38] sm:$0xff] }
 0x41c   :  { %v1895_v25 = vpop.permute.xlu1 %1894  ;;  %1655 = vmatpush.msra.mxu2 %v1638_v23  ;;  %1675 = vmatpush.msra.mxu3 %v1638_v23 }
 0x41d   :  { %v1897_v26 = vunpack.i.h.bf16 %v1895_v25  ;;  %v1896_v27 = vunpack.i.l.bf16 %v1895_v25 }
 0x41f   :  { %v1086_v32 = vsel %vm760_vm3, %v1896_v27, %v1897_v26  ;;  %v1905_v33 = vpop.permute.xlu0 %1904  ;;  %v1637_v27 = vld [vmem:[%s3084_s7 + $0x30] sm:$0xff] }
 0x420   :  { %1518 = vmatmul.f32.gmra.mxu2 %v984_v31  ;;  %1573 = vmatmul.f32.gmra.mxu1 %v1086_v32  ;;  %v1907_v35 = vunpack.i.h.bf16 %v1905_v33  ;;  %v1906_v36 = vunpack.i.l.bf16 %v1905_v33  ;;  %v1636_v31 = vld [vmem:[%s3084_s7 + $0x28] sm:$0xff] }
 0x421   :  { %1656 = vmatpush.msra.mxu2 %v1637_v27  ;;  %1676 = vmatpush.msra.mxu3 %v1637_v27 }
 0x422   :  { %v1087_v42 = vsel %vm760_vm3, %v1906_v36, %v1907_v35  ;;  %v1635_v35 = vld [vmem:[%s3084_s7 + $0x20] sm:$0xff] }
 0x423   :  { %1602 = vmatmul.f32.gmra.mxu0 %v1158_v34  ;;  %1657 = vmatpush.msra.mxu2 %v1636_v31 }
 0x424   :  { %v1910_v38 = vpop.permute.xlu1 %1909  ;;  %1677 = vmatpush.msra.mxu3 %v1636_v31 }
 0x425   :  { %v1912_v39 = vunpack.i.h.bf16 %v1910_v38  ;;  %v1911_v40 = vunpack.i.l.bf16 %v1910_v38  ;;  %1658 = vmatpush.msra.mxu2 %v1635_v35 }
 0x426   :  { %1678 = vmatpush.msra.mxu3 %v1635_v35 }
 0x427   :  { %v1159_v43 = vsel %vm805_vm4, %v1911_v40, %v1912_v39 }
 0x428   :  { %1576 = vmatmul.f32.gmra.mxu1 %v1087_v42  ;;  %v1634_v42 = vld [vmem:[%s3084_s7 + $0x18] sm:$0xff] }
 0x429   :  { %1659 = vmatpush.msra.mxu2 %v1634_v42  ;;  %1679 = vmatpush.msra.mxu3 %v1634_v42 }
 0x42b   :  { %1605 = vmatmul.f32.gmra.mxu0 %v1159_v43 }
 0x441   :  { %v1394_v53 = vpop.f32.mrf.mxu2 }
 0x442   :  { %v1395_v15 = vadd.f32 %v1394_v53, %v1365_v44  ;;  %v1632_v53 = vld [vmem:[%s3084_s7 + $0x8] sm:$0xff] }
 0x459   :  { %v1423_v47 = vpop.f32.mrf.mxu3 }
 0x45a   :  { %v1424_v17 = vadd.f32 %v1423_v47, %v1395_v15  ;;  %v1633_v47 = vld [vmem:[%s3084_s7 + $0x10] sm:$0xff] }
 0x45b   :  { %1660 = vmatpush.msra.mxu2 %v1633_v47  ;;  %1680 = vmatpush.msra.mxu3 %v1633_v47 }
 0x45c   :  { %v1453_v56 = vadd.f32 %v1452_v41, %v1424_v17 }
 0x45d   :  { %1661 = vmatpush.msra.mxu2 %v1632_v53  ;;  %1681 = vmatpush.msra.mxu3 %v1632_v53 }
 0x461   :  { %v1426_v51 = vpop.f32.mrf.mxu3 }
 0x469   :  { %v1429_v28 = vpop.f32.mrf.mxu3 }
 0x470   :  { %v1481_v54 = vpop.f32.mrf.mxu0 }
 0x471   :  { %v1432_v1 = vpop.f32.mrf.mxu3  ;;  %v1482_v24 = vadd.f32 %v1481_v54, %v1453_v56 }
 0x473   :  { %v1397_v57 = vpop.f32.mrf.mxu2 }
 0x474   :  { %v1398_v58 = vadd.f32 %v1397_v57, %v1368_v45 }
 0x476   :  { %v1427_v13 = vadd.f32 %v1426_v51, %v1398_v58 }
 0x478   :  { %v1484_v60 = vpop.f32.mrf.mxu0  ;;  %v1456_v18 = vadd.f32 %v1455_v2, %v1427_v13 }
 0x479   :  { %v1539_v8 = vpop.f32.mrf.mxu3 }
 0x47a   :  { %v1485_v62 = vadd.f32 %v1484_v60, %v1456_v18 }
 0x47b   :  { %v1400_v0 = vpop.f32.mrf.mxu2 }
 0x47c   :  { %v1401_v16 = vadd.f32 %v1400_v0, %v1371_v46 }
 0x47e   :  { %v1430_v22 = vadd.f32 %v1429_v28, %v1401_v16  ;;  %v1631_v28 = vld [vmem:[%s3084_s7] sm:$0xff] }
 0x47f   :  { %1662 = vmatpush.msra.mxu2 %v1631_v28  ;;  %1682 = vmatpush.msra.mxu3 %v1631_v28 }
 0x480   :  { %v1487_v5 = vpop.f32.mrf.mxu0  ;;  %v1459_v50 = vadd.f32 %v1458_v63, %v1430_v22 }
 0x481   :  { %v1542_v21 = vpop.f32.mrf.mxu3  ;;  %1749 = vmatpush.msrb.mxu2 %v2968_v37 }
 0x482   :  { %v1488_v32 = vadd.f32 %v1487_v5, %v1459_v50 }
 0x483   :  { %v1403_v6 = vpop.f32.mrf.mxu2 }
 0x484   :  { %v1404_v25 = vadd.f32 %v1403_v6, %v1374_v49 }
 0x486   :  { %v1433_v33 = vadd.f32 %v1432_v1, %v1404_v25 }
 0x488   :  { %v3007_v9 = vpop.f32.mrf.mxu0  ;;  %v1462_v44 = vadd.f32 %v1461_v55, %v1433_v33  ;;  %v1691_v33 = vld [vmem:[%s3089_s5] sm:$0x1] }
 0x489   :  { %v1545_v36 = vpop.f32.mrf.mxu3 }
 0x48a   :  { %v1491_v54 = vadd.f32 %v3007_v9, %v1462_v44 }
 0x48b   :  { %v1510_v61 = vpop.f32.mrf.mxu2 }
 0x48c   :  { %v1511_v29 = vadd.f32 %v1510_v61, %v1482_v24 }
 0x48d   :  { %v1568_v14 = vpop.f32.mrf.mxu1 }
 0x48e   :  { %v1540_v39 = vadd.f32 %v1539_v8, %v1511_v29 }
 0x490   :  { %v1597_v52 = vpop.f32.mrf.mxu0  ;;  %v1569_v41 = vadd.f32 %v1568_v14, %v1540_v39 }
 0x491   :  { %v1548_v1 = vpop.f32.mrf.mxu3 }
 0x492   :  { %v3045_v60 = vadd.f32 %v1597_v52, %v1569_v41 }
 0x493   :  { %v1513_v19 = vpop.f32.mrf.mxu2 }
 0x494   :  { %v1514_v26 = vadd.f32 %v1513_v19, %v1485_v62  ;;  %v1618_v48 = vmul.f32 %v3045_v60, %v3045_v60 }
 0x495   :  { %v1571_v12 = vpop.f32.mrf.mxu1 }
 0x496   :  { %v1543_v34 = vadd.f32 %v1542_v21, %v1514_v26 }
 0x498   :  { %v1600_v30 = vpop.f32.mrf.mxu0  ;;  %v1572_v45 = vadd.f32 %v1571_v12, %v1543_v34 }
 0x49a   :  { %v3040_v2 = vadd.f32 %v1600_v30, %v1572_v45 }
 0x49b   :  { %v1516_v38 = vpop.f32.mrf.mxu2 }
 0x49c   :  { %v1517_v40 = vadd.f32 %v1516_v38, %v1488_v32  ;;  %v1619_v3 = vmul.f32 %v3040_v2, %v3040_v2  ;;  %v1609_v6 = vadd.f32 %v3040_v2, %v3045_v60  ;;  %v1704_v38 = vld [vmem:[%s3090_s6] sm:$0x1] }
 0x49d   :  { %v1574_v43 = vpop.f32.mrf.mxu1 }
 0x49e   :  { %v1546_v46 = vadd.f32 %v1545_v36, %v1517_v40  ;;  %v1622_v8 = vadd.f32 %v1619_v3, %v1618_v48 }
 0x4a0   :  { %v1575_v49 = vadd.f32 %v1574_v43, %v1546_v46  ;;  %v1603_v51 = vpop.f32.mrf.mxu0 }
 0x4a2   :  { %v3047_v63 = vadd.f32 %v1603_v51, %v1575_v49 }
 0x4a3   :  { %v1519_v57 = vpop.f32.mrf.mxu2 }
 0x4a4   :  { %v1520_v0 = vadd.f32 %v1519_v57, %v1491_v54  ;;  %v1620_v55 = vmul.f32 %v3047_v63, %v3047_v63  ;;  %v1610_v58 = vadd.f32 %v1609_v6, %v3047_v63 }
 0x4a5   :  { %v1577_v5 = vpop.f32.mrf.mxu1 }
 0x4a6   :  { %v1549_v4 = vadd.f32 %v1548_v1, %v1520_v0  ;;  %v1623_v10 = vadd.f32 %v1622_v8, %v1620_v55 }
 0x4a8   :  { %v1578_v7 = vadd.f32 %v1577_v5, %v1549_v4  ;;  %v1606_v59 = vpop.f32.mrf.mxu0 }
 0x4aa   :  { %v1607_v9 = vadd.f32 %v1606_v59, %v1578_v7 }
 0x4ac   :  { %v1611_v11 = vadd.f32 %v1610_v58, %v1607_v9  ;;  %v1621_v61 = vmul.f32 %v1607_v9, %v1607_v9 }
 0x4ae   :  { %v1612_v37 = vrot.slane %v1611_v11, 4  ;;  %v1624_v13 = vadd.f32 %v1623_v10, %v1621_v61 }
 0x4b0   :  { %v1613_v14 = vadd.f32 %v1612_v37, %v1611_v11  ;;  %v1625_v15 = vrot.slane %v1624_v13, 4 }
 0x4b2   :  { %v1614_v16 = vrot.slane %v1613_v14, 2  ;;  %v1626_v17 = vadd.f32 %v1625_v15, %v1624_v13 }
 0x4b4   :  { %v1615_v18 = vadd.f32 %v1614_v16, %v1613_v14  ;;  %v1627_v52 = vrot.slane %v1626_v17, 2 }
 0x4b6   :  { %v1616_v21 = vrot.slane %v1615_v18, 1  ;;  %v1628_v22 = vadd.f32 %v1627_v52, %v1626_v17 }
 0x4b8   :  { %v1617_v19 = vadd.f32 %v1616_v21, %v1615_v18  ;;  %v1629_v56 = vrot.slane %v1628_v22, 1 }
 0x4ba   :  { %1663 = vmatmul.f32.vlgmr.msra.gmra.mxu2 %v1617_v19  ;;  %v1630_v62 = vadd.f32 %v1629_v56, %v1628_v22 }
 0x4bc   :  { %1683 = vmatmul.f32.vlgmr.msra.gmra.mxu3 %v1630_v62 }
 0x53d   :  { %v1664_v20 = vpop.f32.mrf.mxu2 }
 0x53e   :  { %v1687_v23 = vmul.f32 0.001953125, %v1664_v20 }
 0x53f   :  { %v1684_v12 = vpop.f32.mrf.mxu3 }
 0x540   :  { %v1689_v24 = vmul.f32 %v1687_v23, %v1687_v23  ;;  %v1688_v50 = vmul.f32 0.001953125, %v1684_v12 }
 0x542   :  { %v1690_v25 = vsub.f32 %v1688_v50, %v1689_v24 }
 0x544   :  { %v1692_v26 = vadd.f32 1e-05, %v1690_v25 }
 0x546   :  { %1915 = vrsqrt.f32 %v1692_v26  ;;  %vm1699_vm6 = vweird.f32 %v1692_v26 }
 0x54c   :  { %v1916_v27 = vpop.eup %1915 }
 0x54d   :  { %v1694_v29 = vmul.f32 %v1916_v27, %v1692_v26  ;;  %vm1700_vm5 = vweird.f32 %v1916_v27 }
 0x54e   :  { %vm1701_vm7 = vmor %vm1699_vm6, %vm1700_vm5 }
 0x54f   :  { %v1695_v30 = vmul.f32 %v1916_v27, %v1694_v29 }
 0x551   :  { %v1696_v31 = vmul.f32 0.5, %v1695_v30 }
 0x553   :  { %v1697_v32 = vsub.f32 1.5, %v1696_v31 }
 0x555   :  { %v1698_v34 = vmul.f32 %v1916_v27, %v1697_v32 }
 0x557   :  { %v1702_v35 = vsel %vm1701_vm7, %v1916_v27, %v1698_v34 }
 0x558   :  { %v1703_v36 = vmul.f32 %v1702_v35, %v1691_v33 }
 0x55a   :  { %v1705_v39 = vmul.f32 %v1703_v36, %v1687_v23  ;;  %1782 = vmatmul.msk.f32.vlgmr.msrb.gmra.mxu1 %vm599_vm8, %v1703_v36 }
 0x55c   :  { %v1706_v40 = vsub.f32 %v1704_v38, %v1705_v39 }
 0x55e   :  { %1783 = vmatmul.msk.f32.vlgmr.msrb.gmra.mxu2 %vm599_vm8, %v1706_v40 }
 0x5d7   :  { %v1728_v42 = vpop.f32.mrf.mxu1 }
 0x5d8   :  { %v1754_v43 = vperm.slane %v1728_v42, 0 }
 0x5da   :  { %v1755_v44 = vmul.f32 %v1754_v43, %v3045_v60  ;;  %v1756_v46 = vmul.f32 %v1754_v43, %v3040_v2  ;;  %v1757_v47 = vmul.f32 %v1754_v43, %v3047_v63  ;;  %v1758_v41 = vmul.f32 %v1754_v43, %v1607_v9 }
 0x5e1   :  { %v1751_v45 = vpop.f32.mrf.mxu2 }
 0x5e2   :  { %v1759_v49 = vperm.slane %v1751_v45, 0 }
 0x5e4   :  { %v1760_v51 = vadd.f32 %v1759_v49, %v1755_v44  ;;  %v1761_v53 = vadd.f32 %v1759_v49, %v1756_v46  ;;  %v1762_v54 = vadd.f32 %v1759_v49, %v1757_v47  ;;  %v1763_v28 = vadd.f32 %v1759_v49, %v1758_v41 }
 0x5e6   :  { %v1764_v57 = vmax.f32 %v1760_v51, 0.0  ;;  %v1765_v0 = vmax.f32 %v1761_v53, 0.0  ;;  %v1766_v1 = vmax.f32 %v1762_v54, 0.0  ;;  %v1767_v3 = vmax.f32 %v1763_v28, 0.0 }
 0x5e8   :  { %1768 = vst [vmem:[%s3091_s9] sm:$0xff] %v1764_v57 }
 0x5e9   :  { %1769 = vst [vmem:[%s3091_s9 + $0x8] sm:$0xff] %v1765_v0 }
 0x5ea   :  { %1770 = vst [vmem:[%s3091_s9 + $0x10] sm:$0xff] %v1766_v1 }
 0x5eb   :  { %1771 = vst [vmem:[%s3091_s9 + $0x18] sm:$0xff] %v1767_v3 }

</bundles_post_ra>
